<compile_context>
chip_gen: v5e
topology: v5e:2x2
jax: 0.10.0
libtpu: 0.0.40
codegen_flags: <defaults>
</compile_context>

<pallas_src>
import jax
import jax.numpy as jnp
import numpy as np
from jax.experimental import pallas as pl
from jax.experimental.pallas import tpu as pltpu

# ---- Model configuration (mirrors IceHockeyModel.__init__ arguments) ----
OBS_DIM = 32
NET_ARCH = [32, 32]
ACTION_LOGITS_DIMS_LIST = [5, 3, 4]
ACTION_LOGITS_DIM = sum(ACTION_LOGITS_DIMS_LIST)          # 12
ACTION_SPACE_DIM = len(ACTION_LOGITS_DIMS_LIST)           # 3
ACCEL_DIV = 100.0

# ---- Packing configuration: fold PACK batch rows into the 128-lane dimension ----
PACK = 4
LANE = PACK * OBS_DIM                                      # 128 (full vreg lane width)
LOGIT_LANES = PACK * ACTION_LOGITS_DIM                     # 48 real logit lanes
OUT_LANES = PACK * ACTION_SPACE_DIM                        # 12 packed output lanes
ROW_ALIGN = PACK * 8                                       # packed sublane dim stays % 8 == 0
_HEAD_BOUNDS = tuple(int(b) for b in np.cumsum(ACTION_LOGITS_DIMS_LIST))          # (5, 8, 12)
_HEAD_STARTS = tuple(int(s) for s in np.cumsum([0] + ACTION_LOGITS_DIMS_LIST[:-1]))
_MAX_SHIFT = max(ACTION_LOGITS_DIMS_LIST) - 1              # 4
_JUNK_GIDX = 100                                           # sentinel for padding lanes >= 48


def _lane_mod(x, m, n):
    """x % m for int arrays with values in [0, n), via conditional subtraction (VPU-safe)."""
    t = m
    while t * 2 < n:
        t *= 2
    r = x
    while t >= m:
        r = jnp.where(r >= t, r - t, r)
        t //= 2
    return r


def ice_hockey_kernel(obs_ref, w1_ref, b1_ref, w2_ref, b2_ref, w3_ref, b3_ref,
                      selm_ref, seloff_ref, out_ref):
    # --- Packed 3-layer MLP: PACK batch rows per sublane row, full 128-lane occupancy ---
    x = obs_ref[...]                                                          # (tb4, 128)
    h = jnp.tanh(jnp.dot(x, w1_ref[...], preferred_element_type=jnp.float32) + b1_ref[...])
    h = jnp.tanh(jnp.dot(h, w2_ref[...], preferred_element_type=jnp.float32) + b2_ref[...])
    logits = jnp.dot(h, w3_ref[...], preferred_element_type=jnp.float32) + b3_ref[...]

    tb4 = logits.shape[0]
    lane_idx = jax.lax.broadcasted_iota(jnp.int32, (tb4, LANE), 1)
    gidx = _lane_mod(lane_idx, ACTION_LOGITS_DIM, LANE)                       # index within group
    gidx = jnp.where(lane_idx < LOGIT_LANES, gidx, _JUNK_GIDX)                # padding -> sentinel
    hid = jnp.zeros_like(gidx)
    for b in _HEAD_BOUNDS:                                                    # head id (junk -> 3)
        hid = hid + (gidx >= b).astype(jnp.int32)
    hid_f = hid.astype(jnp.float32)
    lane_f = lane_idx.astype(jnp.float32)

    # A lane is its head's argmax (first-index tie-break, matching torch.argmax on the raw
    # logits, which softmax/logsumexp preserve) iff (logit, -lane) lexicographically beats
    # every other lane of the same head.  Head width <= 5, so the 8 cyclic neighbours at
    # distance 1..4 cover every in-head pair; lanes from other heads / groups / padding are
    # neutralised by the head-id check.  Rolling value/head-id/lane-id together makes the
    # logic independent of the roll direction convention.
    good = lane_idx >= 0
    for d in range(1, _MAX_SHIFT + 1):
        for s in (d, LANE - d):
            r_val = pltpu.roll(logits, shift=s, axis=1)
            r_hid = pltpu.roll(hid_f, shift=s, axis=1)
            r_lane = pltpu.roll(lane_f, shift=s, axis=1)
            beats = (logits > r_val) | ((logits == r_val) & (lane_f < r_lane))
            good = good & ((r_hid != hid_f) | beats)
    indicator = (good & (gidx < ACTION_LOGITS_DIM)).astype(jnp.float32)       # one-hot per head

    # Indicator -> final outputs via one tiny MXU matmul; the /accel_div scale lives in the
    # selection matrix, the "-1.0" offset of head 1 in seloff.  Output stays packed (tb4,12).
    out_ref[...] = (jnp.dot(indicator, selm_ref[...], preferred_element_type=jnp.float32)
                    + seloff_ref[...])


# ---------------------------- wrapper-side parameter packing ----------------------------

def _block_diag(w, total_cols=None):
    d_in, d_out = w.shape
    cols = PACK * d_out if total_cols is None else total_cols
    out = jnp.zeros((PACK * d_in, cols), jnp.float32)
    for g in range(PACK):
        out = out.at[g * d_in:(g + 1) * d_in, g * d_out:(g + 1) * d_out].set(w)
    return out


def _selection_constants():
    m = np.zeros((LANE, OUT_LANES), np.float32)
    off = np.zeros((1, OUT_LANES), np.float32)
    for g in range(PACK):
        for h, (start, size) in enumerate(zip(_HEAD_STARTS, ACTION_LOGITS_DIMS_LIST)):
            col = g * ACTION_SPACE_DIM + h
            if h == 1:
                off[0, col] = -1.0                                 # res[1] -= 1.0
            for li in range(size):
                val = np.float32(li)
                if h == 0:
                    val = np.float32(val / np.float32(ACCEL_DIV))  # res[0] /= accel_div
                m[g * ACTION_LOGITS_DIM + start + li, col] = val
    return jnp.asarray(m), jnp.asarray(off)


def pack_params(params):
    """Block-diagonal weights / tiled biases that fold PACK batch rows into the lane dim."""
    w1, b1, w2, b2, w3, b3 = params
    w1p = _block_diag(w1)                                   # (128, 128)
    w2p = _block_diag(w2)                                   # (128, 128)
    w3p = _block_diag(w3, total_cols=LANE)                  # (128, 128); cols 48..127 are zero
    b1p = jnp.tile(b1.reshape(1, -1), (1, PACK))            # (1, 128)
    b2p = jnp.tile(b2.reshape(1, -1), (1, PACK))
    b3p = jnp.concatenate(
        [jnp.tile(b3.reshape(1, -1), (1, PACK)),
         jnp.full((1, LANE - LOGIT_LANES), -1e30, jnp.float32)], axis=1)  # padding lanes very low
    selm, seloff = _selection_constants()
    return [w1p, b1p, w2p, b2p, w3p, b3p, selm, seloff]


# ------------------------------------ forward wrapper ------------------------------------

def _round_up(x, m):
    return ((x + m - 1) // m) * m


def _choose_tile_rows(batch, max_tile_rows=2048, min_steps=2):
    """Largest aligned batch tile <= max_tile_rows, keeping >= min_steps grid steps (so both
    v7x TensorCores get work) whenever the batch is big enough."""
    b_al = _round_up(max(int(batch), 1), ROW_ALIGN)
    tile = min(_round_up(max_tile_rows, ROW_ALIGN), b_al)
    if b_al // tile < min_steps and b_al >= min_steps * ROW_ALIGN:
        tile = _round_up(-(-b_al // min_steps), ROW_ALIGN)
    return tile


def ice_hockey_forward(observations, params, *, max_tile_rows=2048):
    """observations: (B, OBS_DIM) or (OBS_DIM,) float32 -> (B, ACTION_SPACE_DIM) float32.
    Column i of the result corresponds to res[i] of the PyTorch forward."""
    obs2d = jnp.asarray(observations, jnp.float32).reshape(-1, OBS_DIM)
    b_in = obs2d.shape[0]
    tile_rows = _choose_tile_rows(b_in, max_tile_rows)
    padded_b = _round_up(max(b_in, 1), tile_rows)
    if padded_b != b_in:
        obs2d = jnp.pad(obs2d, ((0, padded_b - b_in), (0, 0)))
    obs_packed = obs2d.reshape(padded_b // PACK, LANE)       # contiguous: 4 rows -> 128 lanes

    packed = pack_params(params)
    tile4 = tile_rows // PACK
    grid = (padded_b // tile_rows,)

    param_specs = [pl.BlockSpec(p.shape, lambda i: (0, 0)) for p in packed]
    out = pl.pallas_call(
        ice_hockey_kernel,
        out_shape=jax.ShapeDtypeStruct((padded_b // PACK, OUT_LANES), jnp.float32),
        grid=grid,
        in_specs=[pl.BlockSpec((tile4, LANE), lambda i: (i, 0))] + param_specs,
        out_specs=pl.BlockSpec((tile4, OUT_LANES), lambda i: (i, 0)),
        compiler_params=pltpu.CompilerParams(dimension_semantics=("parallel",)),
    )(obs_packed, *packed)
    return out.reshape(padded_b, ACTION_SPACE_DIM)[:b_in]


# ---------------------------------- params / reference ----------------------------------

def init_params(key):
    """Deterministic synthetic parameters with the shapes implied by __init__."""
    dims = [OBS_DIM] + NET_ARCH + [ACTION_LOGITS_DIM]
    params = []
    for d_in, d_out in zip(dims[:-1], dims[1:]):
        key, kw, kb = jax.random.split(key, 3)
        scale = 1.0 / jnp.sqrt(jnp.float32(d_in))
        # stored as (in_features, out_features): y = x @ W + b  ==  PyTorch x @ W.T + b
        w = jax.random.normal(kw, (d_in, d_out), dtype=jnp.float32) * scale
        b = jax.random.normal(kb, (1, d_out), dtype=jnp.float32) * 0.01
        params += [w, b]
    return params  # [w1, b1, w2, b2, w3, b3]


def _reference_forward(obs, params):
    """Pure-JAX reference with the same forward semantics (for a sanity check)."""
    w1, b1, w2, b2, w3, b3 = params
    h = jnp.tanh(obs @ w1 + b1)
    h = jnp.tanh(h @ w2 + b2)
    logits = h @ w3 + b3
    cols, start = [], 0
    for size in ACTION_LOGITS_DIMS_LIST:
        cols.append(jnp.argmax(logits[:, start:start + size], axis=-1).astype(jnp.float32))
        start += size
    res = jnp.stack(cols, axis=-1)
    scale = jnp.array([1.0 / ACCEL_DIV, 1.0, 1.0], jnp.float32)
    offset = jnp.array([0.0, -1.0, 0.0], jnp.float32)
    return res * scale + offset


if __name__ == "__main__":
    key = jax.random.PRNGKey(0)
    k_obs, k_params = jax.random.split(key)

    B = 256  # -> tile of 128 rows (32 packed sublane rows), grid=(2,)
    observations = jax.random.normal(k_obs, (B, OBS_DIM), dtype=jnp.float32)
    params = init_params(k_params)

    result = jax.block_until_ready(ice_hockey_forward(observations, params))
    assert result.shape == (B, ACTION_SPACE_DIM)

    # Sanity check vs a pure-JAX reference (tolerate the astronomically rare rounding-induced
    # argmax tie flip, which would change a value by a full index step).
    ref = jax.block_until_ready(_reference_forward(observations, params))
    bad_rows = int(jnp.sum(jnp.any(jnp.abs(result - ref) > 1e-5, axis=-1)))
    assert bad_rows <= max(1, B // 100), f"{bad_rows}/{B} rows differ from reference"

    print("KERNEL_OK")
</pallas_src>

<mosaic_0001>
module attributes {stable_mosaic.version = 11 : i64} {
  func.func @ice_hockey_kernel(%arg0: i32, %arg1: memref<32x128xf32, #tpu.memory_space<vmem>>, %arg2: memref<128x128xf32, #tpu.memory_space<vmem>>, %arg3: memref<1x128xf32, #tpu.memory_space<vmem>>, %arg4: memref<128x128xf32, #tpu.memory_space<vmem>>, %arg5: memref<1x128xf32, #tpu.memory_space<vmem>>, %arg6: memref<128x128xf32, #tpu.memory_space<vmem>>, %arg7: memref<1x128xf32, #tpu.memory_space<vmem>>, %arg8: memref<128x12xf32, #tpu.memory_space<vmem>>, %arg9: memref<1x12xf32, #tpu.memory_space<vmem>>, %arg10: memref<32x12xf32, #tpu.memory_space<vmem>>) attributes {dimension_semantics = [#tpu.dimension_semantics<parallel>], iteration_bounds = array<i64: 2>, scalar_prefetch = 0 : i64, scratch_operands = 0 : i64, tpu.core_type = #tpu.core_type<tc>, window_params = [{transform_indices = @transform_0, window_bounds = array<i64: 32, 128>}, {pipeline_mode = #tpu.pipeline_mode<synchronous>, transform_indices = @transform_1, window_bounds = array<i64: 128, 128>}, {pipeline_mode = #tpu.pipeline_mode<synchronous>, transform_indices = @transform_2, window_bounds = array<i64: 1, 128>}, {pipeline_mode = #tpu.pipeline_mode<synchronous>, transform_indices = @transform_3, window_bounds = array<i64: 128, 128>}, {pipeline_mode = #tpu.pipeline_mode<synchronous>, transform_indices = @transform_4, window_bounds = array<i64: 1, 128>}, {pipeline_mode = #tpu.pipeline_mode<synchronous>, transform_indices = @transform_5, window_bounds = array<i64: 128, 128>}, {pipeline_mode = #tpu.pipeline_mode<synchronous>, transform_indices = @transform_6, window_bounds = array<i64: 1, 128>}, {pipeline_mode = #tpu.pipeline_mode<synchronous>, transform_indices = @transform_7, window_bounds = array<i64: 128, 12>}, {pipeline_mode = #tpu.pipeline_mode<synchronous>, transform_indices = @transform_8, window_bounds = array<i64: 1, 12>}, {transform_indices = @transform_9, window_bounds = array<i64: 32, 12>}]} {
    %c0 = arith.constant 0 : index
    %c0_0 = arith.constant 0 : index
    %0 = vector.load %arg1[%c0, %c0_0] : memref<32x128xf32, #tpu.memory_space<vmem>>, vector<32x128xf32>
    %c0_1 = arith.constant 0 : index
    %c0_2 = arith.constant 0 : index
    %1 = vector.load %arg2[%c0_1, %c0_2] : memref<128x128xf32, #tpu.memory_space<vmem>>, vector<128x128xf32>
    %cst = arith.constant dense<0.000000e+00> : vector<32x128xf32>
    %2 = tpu.matmul %0, %1, %cst {dimension_numbers = #tpu.dot_dimension_numbers<[1], [0], [0], [1], [0, 0, 1, 1], [], []>} : vector<32x128xf32>, vector<128x128xf32>, vector<32x128xf32> -> vector<32x128xf32>
    %c0_3 = arith.constant 0 : index
    %c0_4 = arith.constant 0 : index
    %3 = vector.load %arg3[%c0_3, %c0_4] : memref<1x128xf32, #tpu.memory_space<vmem>>, vector<1x128xf32>
    %4 = vector.broadcast %3 : vector<1x128xf32> to vector<32x128xf32>
    %5 = arith.addf %2, %4 : vector<32x128xf32>
    %6 = math.tanh %5 : vector<32x128xf32>
    %c0_5 = arith.constant 0 : index
    %c0_6 = arith.constant 0 : index
    %7 = vector.load %arg4[%c0_5, %c0_6] : memref<128x128xf32, #tpu.memory_space<vmem>>, vector<128x128xf32>
    %cst_7 = arith.constant dense<0.000000e+00> : vector<32x128xf32>
    %8 = tpu.matmul %6, %7, %cst_7 {dimension_numbers = #tpu.dot_dimension_numbers<[1], [0], [0], [1], [0, 0, 1, 1], [], []>} : vector<32x128xf32>, vector<128x128xf32>, vector<32x128xf32> -> vector<32x128xf32>
    %c0_8 = arith.constant 0 : index
    %c0_9 = arith.constant 0 : index
    %9 = vector.load %arg5[%c0_8, %c0_9] : memref<1x128xf32, #tpu.memory_space<vmem>>, vector<1x128xf32>
    %10 = vector.broadcast %9 : vector<1x128xf32> to vector<32x128xf32>
    %11 = arith.addf %8, %10 : vector<32x128xf32>
    %12 = math.tanh %11 : vector<32x128xf32>
    %c0_10 = arith.constant 0 : index
    %c0_11 = arith.constant 0 : index
    %13 = vector.load %arg6[%c0_10, %c0_11] : memref<128x128xf32, #tpu.memory_space<vmem>>, vector<128x128xf32>
    %cst_12 = arith.constant dense<0.000000e+00> : vector<32x128xf32>
    %14 = tpu.matmul %12, %13, %cst_12 {dimension_numbers = #tpu.dot_dimension_numbers<[1], [0], [0], [1], [0, 0, 1, 1], [], []>} : vector<32x128xf32>, vector<128x128xf32>, vector<32x128xf32> -> vector<32x128xf32>
    %c0_13 = arith.constant 0 : index
    %c0_14 = arith.constant 0 : index
    %15 = vector.load %arg7[%c0_13, %c0_14] : memref<1x128xf32, #tpu.memory_space<vmem>>, vector<1x128xf32>
    %16 = vector.broadcast %15 : vector<1x128xf32> to vector<32x128xf32>
    %17 = arith.addf %14, %16 : vector<32x128xf32>
    %18 = tpu.iota {dimensions = array<i32: 1>} : vector<32x128xi32>
    %c96_i32 = arith.constant 96 : i32
    %19 = vector.broadcast %c96_i32 : i32 to vector<32x128xi32>
    %20 = arith.cmpi sge, %18, %19 : vector<32x128xi32>
    %c96_i32_15 = arith.constant 96 : i32
    %21 = vector.broadcast %c96_i32_15 : i32 to vector<32x128xi32>
    %22 = arith.subi %18, %21 : vector<32x128xi32>
    %23 = arith.select %20, %22, %18 : vector<32x128xi1>, vector<32x128xi32>
    %c48_i32 = arith.constant 48 : i32
    %24 = vector.broadcast %c48_i32 : i32 to vector<32x128xi32>
    %25 = arith.cmpi sge, %23, %24 : vector<32x128xi32>
    %c48_i32_16 = arith.constant 48 : i32
    %26 = vector.broadcast %c48_i32_16 : i32 to vector<32x128xi32>
    %27 = arith.subi %23, %26 : vector<32x128xi32>
    %28 = arith.select %25, %27, %23 : vector<32x128xi1>, vector<32x128xi32>
    %c24_i32 = arith.constant 24 : i32
    %29 = vector.broadcast %c24_i32 : i32 to vector<32x128xi32>
    %30 = arith.cmpi sge, %28, %29 : vector<32x128xi32>
    %c24_i32_17 = arith.constant 24 : i32
    %31 = vector.broadcast %c24_i32_17 : i32 to vector<32x128xi32>
    %32 = arith.subi %28, %31 : vector<32x128xi32>
    %33 = arith.select %30, %32, %28 : vector<32x128xi1>, vector<32x128xi32>
    %c12_i32 = arith.constant 12 : i32
    %34 = vector.broadcast %c12_i32 : i32 to vector<32x128xi32>
    %35 = arith.cmpi sge, %33, %34 : vector<32x128xi32>
    %c12_i32_18 = arith.constant 12 : i32
    %36 = vector.broadcast %c12_i32_18 : i32 to vector<32x128xi32>
    %37 = arith.subi %33, %36 : vector<32x128xi32>
    %38 = arith.select %35, %37, %33 : vector<32x128xi1>, vector<32x128xi32>
    %c48_i32_19 = arith.constant 48 : i32
    %39 = vector.broadcast %c48_i32_19 : i32 to vector<32x128xi32>
    %40 = arith.cmpi slt, %18, %39 : vector<32x128xi32>
    %c100_i32 = arith.constant 100 : i32
    %41 = vector.broadcast %c100_i32 : i32 to vector<32x128xi32>
    %42 = arith.select %40, %38, %41 : vector<32x128xi1>, vector<32x128xi32>
    %c0_i32 = arith.constant 0 : i32
    %43 = vector.broadcast %c0_i32 : i32 to vector<32x128xi32>
    %c5_i32 = arith.constant 5 : i32
    %44 = vector.broadcast %c5_i32 : i32 to vector<32x128xi32>
    %45 = arith.cmpi sge, %42, %44 : vector<32x128xi32>
    %46 = arith.extui %45 : vector<32x128xi1> to vector<32x128xi32>
    %47 = arith.addi %43, %46 : vector<32x128xi32>
    %c8_i32 = arith.constant 8 : i32
    %48 = vector.broadcast %c8_i32 : i32 to vector<32x128xi32>
    %49 = arith.cmpi sge, %42, %48 : vector<32x128xi32>
    %50 = arith.extui %49 : vector<32x128xi1> to vector<32x128xi32>
    %51 = arith.addi %47, %50 : vector<32x128xi32>
    %c12_i32_20 = arith.constant 12 : i32
    %52 = vector.broadcast %c12_i32_20 : i32 to vector<32x128xi32>
    %53 = arith.cmpi sge, %42, %52 : vector<32x128xi32>
    %54 = arith.extui %53 : vector<32x128xi1> to vector<32x128xi32>
    %55 = arith.addi %51, %54 : vector<32x128xi32>
    %56 = arith.sitofp %55 : vector<32x128xi32> to vector<32x128xf32>
    %57 = arith.sitofp %18 : vector<32x128xi32> to vector<32x128xf32>
    %c0_i32_21 = arith.constant 0 : i32
    %58 = vector.broadcast %c0_i32_21 : i32 to vector<32x128xi32>
    %59 = arith.cmpi sge, %18, %58 : vector<32x128xi32>
    %c1_i32 = arith.constant 1 : i32
    %60 = tpu.dynamic_rotate %17 by %c1_i32 dim 1 : vector<32x128xf32>, i32 -> vector<32x128xf32>
    %c1_i32_22 = arith.constant 1 : i32
    %61 = tpu.dynamic_rotate %56 by %c1_i32_22 dim 1 : vector<32x128xf32>, i32 -> vector<32x128xf32>
    %c1_i32_23 = arith.constant 1 : i32
    %62 = tpu.dynamic_rotate %57 by %c1_i32_23 dim 1 : vector<32x128xf32>, i32 -> vector<32x128xf32>
    %63 = arith.cmpf ogt, %17, %60 : vector<32x128xf32>
    %64 = arith.cmpf oeq, %17, %60 : vector<32x128xf32>
    %65 = arith.cmpf olt, %57, %62 : vector<32x128xf32>
    %66 = arith.andi %64, %65 : vector<32x128xi1>
    %67 = arith.ori %63, %66 : vector<32x128xi1>
    %68 = arith.cmpf one, %61, %56 : vector<32x128xf32>
    %69 = arith.ori %68, %67 : vector<32x128xi1>
    %70 = arith.andi %59, %69 : vector<32x128xi1>
    %c127_i32 = arith.constant 127 : i32
    %71 = tpu.dynamic_rotate %17 by %c127_i32 dim 1 : vector<32x128xf32>, i32 -> vector<32x128xf32>
    %c127_i32_24 = arith.constant 127 : i32
    %72 = tpu.dynamic_rotate %56 by %c127_i32_24 dim 1 : vector<32x128xf32>, i32 -> vector<32x128xf32>
    %c127_i32_25 = arith.constant 127 : i32
    %73 = tpu.dynamic_rotate %57 by %c127_i32_25 dim 1 : vector<32x128xf32>, i32 -> vector<32x128xf32>
    %74 = arith.cmpf ogt, %17, %71 : vector<32x128xf32>
    %75 = arith.cmpf oeq, %17, %71 : vector<32x128xf32>
    %76 = arith.cmpf olt, %57, %73 : vector<32x128xf32>
    %77 = arith.andi %75, %76 : vector<32x128xi1>
    %78 = arith.ori %74, %77 : vector<32x128xi1>
    %79 = arith.cmpf one, %72, %56 : vector<32x128xf32>
    %80 = arith.ori %79, %78 : vector<32x128xi1>
    %81 = arith.andi %70, %80 : vector<32x128xi1>
    %c2_i32 = arith.constant 2 : i32
    %82 = tpu.dynamic_rotate %17 by %c2_i32 dim 1 : vector<32x128xf32>, i32 -> vector<32x128xf32>
    %c2_i32_26 = arith.constant 2 : i32
    %83 = tpu.dynamic_rotate %56 by %c2_i32_26 dim 1 : vector<32x128xf32>, i32 -> vector<32x128xf32>
    %c2_i32_27 = arith.constant 2 : i32
    %84 = tpu.dynamic_rotate %57 by %c2_i32_27 dim 1 : vector<32x128xf32>, i32 -> vector<32x128xf32>
    %85 = arith.cmpf ogt, %17, %82 : vector<32x128xf32>
    %86 = arith.cmpf oeq, %17, %82 : vector<32x128xf32>
    %87 = arith.cmpf olt, %57, %84 : vector<32x128xf32>
    %88 = arith.andi %86, %87 : vector<32x128xi1>
    %89 = arith.ori %85, %88 : vector<32x128xi1>
    %90 = arith.cmpf one, %83, %56 : vector<32x128xf32>
    %91 = arith.ori %90, %89 : vector<32x128xi1>
    %92 = arith.andi %81, %91 : vector<32x128xi1>
    %c126_i32 = arith.constant 126 : i32
    %93 = tpu.dynamic_rotate %17 by %c126_i32 dim 1 : vector<32x128xf32>, i32 -> vector<32x128xf32>
    %c126_i32_28 = arith.constant 126 : i32
    %94 = tpu.dynamic_rotate %56 by %c126_i32_28 dim 1 : vector<32x128xf32>, i32 -> vector<32x128xf32>
    %c126_i32_29 = arith.constant 126 : i32
    %95 = tpu.dynamic_rotate %57 by %c126_i32_29 dim 1 : vector<32x128xf32>, i32 -> vector<32x128xf32>
    %96 = arith.cmpf ogt, %17, %93 : vector<32x128xf32>
    %97 = arith.cmpf oeq, %17, %93 : vector<32x128xf32>
    %98 = arith.cmpf olt, %57, %95 : vector<32x128xf32>
    %99 = arith.andi %97, %98 : vector<32x128xi1>
    %100 = arith.ori %96, %99 : vector<32x128xi1>
    %101 = arith.cmpf one, %94, %56 : vector<32x128xf32>
    %102 = arith.ori %101, %100 : vector<32x128xi1>
    %103 = arith.andi %92, %102 : vector<32x128xi1>
    %c3_i32 = arith.constant 3 : i32
    %104 = tpu.dynamic_rotate %17 by %c3_i32 dim 1 : vector<32x128xf32>, i32 -> vector<32x128xf32>
    %c3_i32_30 = arith.constant 3 : i32
    %105 = tpu.dynamic_rotate %56 by %c3_i32_30 dim 1 : vector<32x128xf32>, i32 -> vector<32x128xf32>
    %c3_i32_31 = arith.constant 3 : i32
    %106 = tpu.dynamic_rotate %57 by %c3_i32_31 dim 1 : vector<32x128xf32>, i32 -> vector<32x128xf32>
    %107 = arith.cmpf ogt, %17, %104 : vector<32x128xf32>
    %108 = arith.cmpf oeq, %17, %104 : vector<32x128xf32>
    %109 = arith.cmpf olt, %57, %106 : vector<32x128xf32>
    %110 = arith.andi %108, %109 : vector<32x128xi1>
    %111 = arith.ori %107, %110 : vector<32x128xi1>
    %112 = arith.cmpf one, %105, %56 : vector<32x128xf32>
    %113 = arith.ori %112, %111 : vector<32x128xi1>
    %114 = arith.andi %103, %113 : vector<32x128xi1>
    %c125_i32 = arith.constant 125 : i32
    %115 = tpu.dynamic_rotate %17 by %c125_i32 dim 1 : vector<32x128xf32>, i32 -> vector<32x128xf32>
    %c125_i32_32 = arith.constant 125 : i32
    %116 = tpu.dynamic_rotate %56 by %c125_i32_32 dim 1 : vector<32x128xf32>, i32 -> vector<32x128xf32>
    %c125_i32_33 = arith.constant 125 : i32
    %117 = tpu.dynamic_rotate %57 by %c125_i32_33 dim 1 : vector<32x128xf32>, i32 -> vector<32x128xf32>
    %118 = arith.cmpf ogt, %17, %115 : vector<32x128xf32>
    %119 = arith.cmpf oeq, %17, %115 : vector<32x128xf32>
    %120 = arith.cmpf olt, %57, %117 : vector<32x128xf32>
    %121 = arith.andi %119, %120 : vector<32x128xi1>
    %122 = arith.ori %118, %121 : vector<32x128xi1>
    %123 = arith.cmpf one, %116, %56 : vector<32x128xf32>
    %124 = arith.ori %123, %122 : vector<32x128xi1>
    %125 = arith.andi %114, %124 : vector<32x128xi1>
    %c4_i32 = arith.constant 4 : i32
    %126 = tpu.dynamic_rotate %17 by %c4_i32 dim 1 : vector<32x128xf32>, i32 -> vector<32x128xf32>
    %c4_i32_34 = arith.constant 4 : i32
    %127 = tpu.dynamic_rotate %56 by %c4_i32_34 dim 1 : vector<32x128xf32>, i32 -> vector<32x128xf32>
    %c4_i32_35 = arith.constant 4 : i32
    %128 = tpu.dynamic_rotate %57 by %c4_i32_35 dim 1 : vector<32x128xf32>, i32 -> vector<32x128xf32>
    %129 = arith.cmpf ogt, %17, %126 : vector<32x128xf32>
    %130 = arith.cmpf oeq, %17, %126 : vector<32x128xf32>
    %131 = arith.cmpf olt, %57, %128 : vector<32x128xf32>
    %132 = arith.andi %130, %131 : vector<32x128xi1>
    %133 = arith.ori %129, %132 : vector<32x128xi1>
    %134 = arith.cmpf one, %127, %56 : vector<32x128xf32>
    %135 = arith.ori %134, %133 : vector<32x128xi1>
    %136 = arith.andi %125, %135 : vector<32x128xi1>
    %c124_i32 = arith.constant 124 : i32
    %137 = tpu.dynamic_rotate %17 by %c124_i32 dim 1 : vector<32x128xf32>, i32 -> vector<32x128xf32>
    %c124_i32_36 = arith.constant 124 : i32
    %138 = tpu.dynamic_rotate %56 by %c124_i32_36 dim 1 : vector<32x128xf32>, i32 -> vector<32x128xf32>
    %c124_i32_37 = arith.constant 124 : i32
    %139 = tpu.dynamic_rotate %57 by %c124_i32_37 dim 1 : vector<32x128xf32>, i32 -> vector<32x128xf32>
    %140 = arith.cmpf ogt, %17, %137 : vector<32x128xf32>
    %141 = arith.cmpf oeq, %17, %137 : vector<32x128xf32>
    %142 = arith.cmpf olt, %57, %139 : vector<32x128xf32>
    %143 = arith.andi %141, %142 : vector<32x128xi1>
    %144 = arith.ori %140, %143 : vector<32x128xi1>
    %145 = arith.cmpf one, %138, %56 : vector<32x128xf32>
    %146 = arith.ori %145, %144 : vector<32x128xi1>
    %147 = arith.andi %136, %146 : vector<32x128xi1>
    %c12_i32_38 = arith.constant 12 : i32
    %148 = vector.broadcast %c12_i32_38 : i32 to vector<32x128xi32>
    %149 = arith.cmpi slt, %42, %148 : vector<32x128xi32>
    %150 = arith.andi %147, %149 : vector<32x128xi1>
    %151 = arith.extui %150 : vector<32x128xi1> to vector<32x128xi32>
    %152 = arith.sitofp %151 : vector<32x128xi32> to vector<32x128xf32>
    %c0_39 = arith.constant 0 : index
    %c0_40 = arith.constant 0 : index
    %153 = vector.load %arg8[%c0_39, %c0_40] : memref<128x12xf32, #tpu.memory_space<vmem>>, vector<128x12xf32>
    %cst_41 = arith.constant dense<0.000000e+00> : vector<32x12xf32>
    %154 = tpu.matmul %152, %153, %cst_41 {dimension_numbers = #tpu.dot_dimension_numbers<[1], [0], [0], [1], [0, 0, 1, 1], [], []>} : vector<32x128xf32>, vector<128x12xf32>, vector<32x12xf32> -> vector<32x12xf32>
    %c0_42 = arith.constant 0 : index
    %c0_43 = arith.constant 0 : index
    %155 = vector.load %arg9[%c0_42, %c0_43] : memref<1x12xf32, #tpu.memory_space<vmem>>, vector<1x12xf32>
    %156 = vector.broadcast %155 : vector<1x12xf32> to vector<32x12xf32>
    %157 = arith.addf %154, %156 : vector<32x12xf32>
    %c0_44 = arith.constant 0 : index
    %c0_45 = arith.constant 0 : index
    %158 = vector.load %arg10[%c0_44, %c0_45] : memref<32x12xf32, #tpu.memory_space<vmem>>, vector<32x12xf32>
    tpu.vector_store %arg10[%c0_44, %c0_45], %157 {strides = array<i32>} : memref<32x12xf32, #tpu.memory_space<vmem>>, vector<32x12xf32>,
    return
  }
  func.func @transform_0(%arg0: i32) -> (i32, i32) {
    %c0_i32 = arith.constant 0 : i32
    %c0_i32_0 = arith.constant 0 : i32
    return %arg0, %c0_i32 : i32, i32
  }
  func.func @transform_1(%arg0: i32) -> (i32, i32) {
    %c0_i32 = arith.constant 0 : i32
    %c0_i32_0 = arith.constant 0 : i32
    %c0_i32_1 = arith.constant 0 : i32
    return %c0_i32, %c0_i32_0 : i32, i32
  }
  func.func @transform_2(%arg0: i32) -> (i32, i32) {
    %c0_i32 = arith.constant 0 : i32
    %c0_i32_0 = arith.constant 0 : i32
    %c0_i32_1 = arith.constant 0 : i32
    return %c0_i32, %c0_i32_0 : i32, i32
  }
  func.func @transform_3(%arg0: i32) -> (i32, i32) {
    %c0_i32 = arith.constant 0 : i32
    %c0_i32_0 = arith.constant 0 : i32
    %c0_i32_1 = arith.constant 0 : i32
    return %c0_i32, %c0_i32_0 : i32, i32
  }
  func.func @transform_4(%arg0: i32) -> (i32, i32) {
    %c0_i32 = arith.constant 0 : i32
    %c0_i32_0 = arith.constant 0 : i32
    %c0_i32_1 = arith.constant 0 : i32
    return %c0_i32, %c0_i32_0 : i32, i32
  }
  func.func @transform_5(%arg0: i32) -> (i32, i32) {
    %c0_i32 = arith.constant 0 : i32
    %c0_i32_0 = arith.constant 0 : i32
    %c0_i32_1 = arith.constant 0 : i32
    return %c0_i32, %c0_i32_0 : i32, i32
  }
  func.func @transform_6(%arg0: i32) -> (i32, i32) {
    %c0_i32 = arith.constant 0 : i32
    %c0_i32_0 = arith.constant 0 : i32
    %c0_i32_1 = arith.constant 0 : i32
    return %c0_i32, %c0_i32_0 : i32, i32
  }
  func.func @transform_7(%arg0: i32) -> (i32, i32) {
    %c0_i32 = arith.constant 0 : i32
    %c0_i32_0 = arith.constant 0 : i32
    %c0_i32_1 = arith.constant 0 : i32
    return %c0_i32, %c0_i32_0 : i32, i32
  }
  func.func @transform_8(%arg0: i32) -> (i32, i32) {
    %c0_i32 = arith.constant 0 : i32
    %c0_i32_0 = arith.constant 0 : i32
    %c0_i32_1 = arith.constant 0 : i32
    return %c0_i32, %c0_i32_0 : i32, i32
  }
  func.func @transform_9(%arg0: i32) -> (i32, i32) {
    %c0_i32 = arith.constant 0 : i32
    %c0_i32_0 = arith.constant 0 : i32
    return %arg0, %c0_i32 : i32, i32
  }
}

</mosaic_0001>

<bundles_post_ra>
// kernel: tpu_custom_call.1
= control target key start
LH: loop header
LB: loop body
LE: loop exit
PB: predicated region body
PF: predicated region fallthrough
CT: control target
= control target key end

     0   :  { %s2329_s0 = inlined_call_operand.hbm [shape: f32[64,128], index: 0, kind: input, shape index: {}]   ;;  %s2330_s1 = inlined_call_operand.vmem [shape: f32[128,128], index: 1, kind: input, shape index: {}]   ;;  %s2331_s2 = inlined_call_operand.vmem [shape: f32[1,128], index: 2, kind: input, shape index: {}]   ;;  %s2332_s3 = inlined_call_operand.hbm [shape: f32[128,128], index: 3, kind: input, shape index: {}]   ;;  %s2333_s4 = inlined_call_operand.vmem [shape: f32[1,128], index: 4, kind: input, shape index: {}]   ;;  %s2334_s5 = inlined_call_operand.hbm [shape: f32[128,128], index: 5, kind: input, shape index: {}]   ;;  %s2335_s6 = inlined_call_operand.vmem [shape: f32[1,128], index: 6, kind: input, shape index: {}]   ;;  %s2336_s7 = inlined_call_operand.vmem [shape: f32[128,12], index: 7, kind: input, shape index: {}]   ;;  %s2337_s8 = inlined_call_operand.vmem [shape: f32[1,12], index: 8, kind: input, shape index: {}]   ;;  %s2338_s9 = inlined_call_operand.vmem [shape: f32[64,12], index: 9, kind: output, shape index: {}]  }
   0x1   :  { %2362 = sst [smem:[#allocation9_spill]] %s2332_s3 }
   0x2   :  { %14 = vsyncpa [#allocation3], 0 }
   0x3   :  { %16 = vsyncpa [#allocation3 + $0x1], 0 }
   0x4   :  { %17 = vsyncpa [#allocation5], 0  ;;  %s1345_s30 = smov 0   ;;  %s1347_s10 = smov 0  }
   0x5   :  { %s1349_s11 = smov 0   ;;  %s1351_s12 = smov 0  }
   0x6 LB: > { %s2339_s13 = sadd.s32 4294967295, %s1279_s12   ;;  %p43_p0 = scmp.ne.s32.totalorder %s1271_s10, %s1267_s30  ;;  %s1279_s12 = sphi %s1351_s12, %s2544_s12   ;;  %s1275_s11 = sphi %s1349_s11, %s2543_s11   ;;  %s1271_s10 = sphi %s1347_s10, %s2542_s10   ;;  %s1267_s30 = sphi %s1345_s30, %s2541_s30  }
   0x7   : > { %p1367_p1 = scmp.eq.s32.totalorder %s2339_s13, 0  ;;  %p1035_p2 = scmp.ge.s32.totalorder %s1279_s12, 1 }
   0x8   : > { %p248_p3 = scmp.lt.s32.totalorder %s1279_s12, 3  ;;  %s2365_s3 = sld [smem:[#allocation9_spill]] }
   0x9   : > { %p1375_p4 = por %p1367_p1, %p43_p0  ;;  %s1281_s20 = smov [#allocation4]  }
   0xa   : > { %p1382_p5 = pnand %p1035_p2, %p248_p3  ;;  %s267_s21 = sshll.u32 %s1281_s20, 4  ;;  %s268_s21 = int_to_ptr.vmem [resolvable:$true] %s267_s21 }
   0xb   : > { %s282_s24 = sshll.u32 %s2334_s5, 4  ;;  %s2340_s25 = smov 128   ;;  %s283_s24 = int_to_ptr.hbm [resolvable:$true] %s282_s24 }
   0xc   : > { %p1069_p6 = pneg %p1382_p5  ;;  %s2341_s26 = smov 8  }
   0xd   : > { %s1284_s27 = smov [#allocation6]   ;;  %s1400_s29 = sadd.s32 1, %s1279_s12  }
   0xe   : > { %s265_s18 = sshll.u32 %s2365_s3, 4  ;;  %p1070_p7 = pnand %p1069_p6, %p1367_p1  ;;  %s266_s18 = int_to_ptr.hbm [resolvable:$true] %s265_s18 }
   0xf   : > { %s284_s28 = sshll.u32 %s1284_s27, 4  ;;  %s30_s30 = sadd.s32 1, %s1275_s11  ;;  %s285_s28 = int_to_ptr.vmem [resolvable:$true] %s284_s28 }
  0x10   : > { %1072 = dma.hbm_to_vmem [thread:$0]  (!%p1070_p7), %s266_s18, 2048, %s268_s21, [#allocation5], %s2340_s25, %s2340_s25, %s2341_s26  }
  0x11   : > { %1075 = dma.hbm_to_vmem [thread:$0]  (!%p1070_p7), %s283_s24, 2048, %s285_s28, [#allocation5], %s2340_s25, %s2340_s25, %s2341_s26  }
  0x12   : > { %s27_s16 = ssub.s32 %s1279_s12, %s1400_s29  ;;  %p37_p8 = scmp.ne.s32.totalorder %s1275_s11, %s1271_s10 }
  0x13   : > { %p28_p9 = scmp.eq.s32.totalorder %s27_s16, 0  ;;  %p38_p10 = scmp.eq.s32.totalorder %s1279_s12, 0 }
  0x14   : > { %s307_s17 = sand.u32 1, %s1275_s11   ;;  %p1082_p12 = scmp.lt.s32.totalorder %s1279_s12, 2 }
  0x15   : > { %s1410_s20 = scalar_select %p28_p9, %s1275_s11, %s30_s30  }
  0x16   : > { %p39_p11 = por %p38_p10, %p37_p8  ;;  %s1039_s18 = sshll.u32 %s307_s17, 5 }
  0x17   : > { %s1058_s21 = sshll.u32 %s1279_s12, 5  ;;  %s311_s28 = scalar_lea.vmem [#allocation2], %s1039_s18 }
  0x18   : > { %s316_s27 = scalar_lea.hbm %s2329_s0, %s1058_s21  ;;  %s319_s13 = sshll.u32 %s311_s28, 4  ;;  %s320_s13 = int_to_ptr.vmem [resolvable:$true] %s319_s13 }
  0x19   : > { %s317_s24 = sshll.u32 %s316_s27, 4  ;;  %p1417_p13 = pnand %p1082_p12, %p39_p11  ;;  %s318_s24 = int_to_ptr.hbm [resolvable:$true] %s317_s24 }
  0x1a   : > { %s308_s30 = scalar_lea.sflag [#allocation3], %s307_s17  ;;  %s1211_s16 = sshra.s32 %s318_s24, 4  ;;  %s1212_s16 = int_to_ptr.hbm [resolvable:$true] %s1211_s16 }
  0x1b   : > { %s1213_s26 = scalar_lea.hbm %s1212_s16, 32  ;;  %p1215_p2 = pneg %p1417_p13 }
  0x1c   : > { %p1214_p0 = scmp.ne.s32.totalorder %s1212_s16, %s1213_s26  ;;  %s1218_s18 = scalar_lea.hbm %s2329_s0, 64 }
  0x1d   : > { %p1219_p7 = scmp.lt.s32.totalorder %s1212_s16, %s2329_s0  ;;  %p1220_p8 = scmp.lt.s32.totalorder %s1218_s18, %s1213_s26 }
  0x1e   : > { %p1216_p3 = pnand %p1215_p2, %p1214_p0 }
  0x1f   : > { %p1221_p9 = por %p1220_p8, %p1219_p7 }
  0x20   : > { %p1217_p6 = pneg %p1216_p3 }
  0x22   : > { %p1222_p10 = pnand %p1221_p9, %p1217_p6 }
  0x24   : > { %1225 = shalt.err (!%p1222_p10)
}
  0x25   : > { %s2368_s17 = smov 8   ;;  %s2369_s28 = smov 128  }
  0x26   : > { %1079 = dma.hbm_to_vmem [thread:$0]  (!%p1417_p13), %s318_s24, 512, %s320_s13, %s308_s30, %s2369_s28, %s2369_s28, %s2368_s17  }
  0x27   : > { %331 = sbr.rel (%p1382_p5) target bundleno = 859 (0x35b), region = 56  ;;  %s333_s21 = sand.u32 (!%p1382_p5), 1, %s1271_s10  }
  0x28   : > { %s1043_s22 = sshll.u32 (!%p1382_p5), %s333_s21, 5  ;;  %s334_s3 = scalar_lea.sflag (!%p1382_p5), [#allocation3], %s333_s21 }
  0x29   : > { %s1437_s23 = scalar_lea.vmem (!%p1382_p5), [#allocation2], %s1043_s22 }
  0x2c   : > { %1258 = dma.done.wait (%p1375_p4), %s334_s3, 512  }
  0x2d   : > { %1260 = vsyncadd (%p1375_p4), %s334_s3, 4294966784 }
  0x2e   : > { %1262 = dma.done.wait (%p1367_p1), [#allocation5], 4096  }
  0x2f   : > { %1264 = vsyncadd (%p1367_p1), [#allocation5], 4294963200  ;;  %v409_v0 = vld [vmem:[%s2330_s1 + $0x78] sm:$0xff]  ;;  %v408_v1 = vld [vmem:[%s2330_s1 + $0x70] sm:$0xff]  ;;  %s1285_s26 = smov 127   ;;  %s1286_s24 = smov 1  }
  0x30   : > { %414 = vmatpush.msra.mxu0 %v409_v0  ;;  %v407_v2 = vld [vmem:[%s2330_s1 + $0x68] sm:$0xff]  ;;  %v406_v3 = vld [vmem:[%s2330_s1 + $0x60] sm:$0xff]  ;;  %v405_v4 = vld [vmem:[%s2330_s1 + $0x58] sm:$0xff]  ;;  %s1287_s30 = smov 2   ;;  %s1288_s3 = smov 126  }
  0x31   : > { %v404_v5 = vld [vmem:[%s2330_s1 + $0x50] sm:$0xff]  ;;  %v403_v6 = vld [vmem:[%s2330_s1 + $0x48] sm:$0xff]  ;;  %v402_v7 = vld [vmem:[%s2330_s1 + $0x40] sm:$0xff]  ;;  %s1290_s15 = smov 3   ;;  %s1291_s14 = smov 125  }
  0x32   : > { %415 = vmatpush.msra.mxu0 %v408_v1  ;;  %v401_v8 = vld [vmem:[%s2330_s1 + $0x38] sm:$0xff]  ;;  %v400_v9 = vld [vmem:[%s2330_s1 + $0x30] sm:$0xff]  ;;  %v399_v10 = vld [vmem:[%s2330_s1 + $0x28] sm:$0xff]  ;;  %s1292_s16 = smov 4   ;;  %s1293_s18 = smov 124  }
  0x33   : > { %v398_v11 = vld [vmem:[%s2330_s1 + $0x20] sm:$0xff]  ;;  %v397_v12 = vld [vmem:[%s2330_s1 + $0x18] sm:$0xff]  ;;  %v396_v13 = vld [vmem:[%s2330_s1 + $0x10] sm:$0xff] }
  0x34   : > { %416 = vmatpush.msra.mxu0 %v407_v2  ;;  %v462_v14 = vld [vmem:[#allocation4 + $0x78] sm:$0xff]  ;;  %v461_v15 = vld [vmem:[#allocation4 + $0x70] sm:$0xff]  ;;  %v395_v16 = vld [vmem:[%s2330_s1 + $0x8] sm:$0xff] }
  0x35   : > { %467 = vmatpush.msra.mxu1 %v462_v14  ;;  %v460_v17 = vld [vmem:[#allocation4 + $0x68] sm:$0xff]  ;;  %v394_v18 = vld [vmem:[%s2330_s1] sm:$0xff]  ;;  %v458_v21 = vld [vmem:[#allocation4 + $0x58] sm:$0xff] }
  0x36   : > { %417 = vmatpush.msra.mxu0 %v406_v3  ;;  %v459_v19 = vld [vmem:[#allocation4 + $0x60] sm:$0xff]  ;;  %v457_v22 = vld [vmem:[#allocation4 + $0x50] sm:$0xff]  ;;  %v456_v23 = vld [vmem:[#allocation4 + $0x48] sm:$0xff] }
  0x37   : > { %468 = vmatpush.msra.mxu1 %v461_v15  ;;  %v390_v20 = vld [vmem:[%s1437_s23] sm:$0xff]  ;;  %v391_v25 = vld [vmem:[%s1437_s23 + $0x8] sm:$0xff]  ;;  %v454_v26 = vld [vmem:[#allocation4 + $0x38] sm:$0xff] }
  0x38   : > { %418 = vmatpush.msra.mxu0 %v405_v4  ;;  %v455_v24 = vld [vmem:[#allocation4 + $0x40] sm:$0xff]  ;;  %v453_v27 = vld [vmem:[#allocation4 + $0x30] sm:$0xff]  ;;  %v452_v28 = vld [vmem:[#allocation4 + $0x28] sm:$0xff]  ;;  %v549_v4 = vlaneseq }
  0x39   : > { %469 = vmatpush.msra.mxu1 %v460_v17  ;;  %v392_v29 = vld [vmem:[%s1437_s23 + $0x10] sm:$0xff]  ;;  %v393_v30 = vld [vmem:[%s1437_s23 + $0x18] sm:$0xff]  ;;  %v451_v31 = vld [vmem:[#allocation4 + $0x20] sm:$0xff] }
  0x3a   : > { %419 = vmatpush.msra.mxu0 %v404_v5  ;;  %v450_v32 = vld [vmem:[#allocation4 + $0x18] sm:$0xff]  ;;  %v449_v33 = vld [vmem:[#allocation4 + $0x10] sm:$0xff]  ;;  %v448_v34 = vld [vmem:[#allocation4 + $0x8] sm:$0xff]  ;;  %v550_v5 = vand.u32 127, %v549_v4 }
  0x3b   : > { %470 = vmatpush.msra.mxu1 %v459_v19  ;;  %v447_v35 = vld [vmem:[#allocation4] sm:$0xff]  ;;  %v515_v39 = vld [vmem:[#allocation6 + $0x78] sm:$0xff]  ;;  %v514_v40 = vld [vmem:[#allocation6 + $0x70] sm:$0xff] }
  0x3c   : > { %420 = vmatpush.msra.mxu0 %v403_v6  ;;  %v1131_v36 = vld [vmem:[%s2331_s2] ss:$0 sm:$0xff]  ;;  %520 = vmatpush.msra.mxu2 %v515_v39  ;;  %v513_v41 = vld [vmem:[#allocation6 + $0x68] sm:$0xff]  ;;  %v511_v44 = vld [vmem:[#allocation6 + $0x58] sm:$0xff]  ;;  %v1505_v6 = vcvt.s32.f32 %v550_v5  ;;  %vm551_vm0 = vcmp.ge.s32.totalorder %v550_v5, 96  ;;  %vm563_vm4 = vcmp.lt.s32.totalorder %v550_v5, 48 }
  0x3d   : > { %471 = vmatpush.msra.mxu1 %v458_v21  ;;  %v512_v42 = vld [vmem:[#allocation6 + $0x60] sm:$0xff]  ;;  %v510_v47 = vld [vmem:[#allocation6 + $0x50] sm:$0xff]  ;;  %v509_v48 = vld [vmem:[#allocation6 + $0x48] sm:$0xff] }
  0x3e   : > { %421 = vmatpush.msra.mxu0 %v402_v7  ;;  %521 = vmatpush.msra.mxu2 %v514_v40  ;;  %v508_v49 = vld [vmem:[#allocation6 + $0x40] sm:$0xff]  ;;  %v507_v51 = vld [vmem:[#allocation6 + $0x38] sm:$0xff]  ;;  %v506_v54 = vld [vmem:[#allocation6 + $0x30] sm:$0xff]  ;;  %v1048_v7 = vadd.s32 4294967200, %v550_v5 }
  0x3f   : > { %472 = vmatpush.msra.mxu1 %v457_v22  ;;  %v505_v55 = vld [vmem:[#allocation6 + $0x28] sm:$0xff]  ;;  %v504_v60 = vld [vmem:[#allocation6 + $0x20] sm:$0xff]  ;;  %v503_v61 = vld [vmem:[#allocation6 + $0x18] sm:$0xff]  ;;  %624 = vrot.lane.b32.xlu1 %v1505_v6, %s1285_s26  ;;  %v1289_v22 = vmov 0  }
  0x40   : > { %422 = vmatpush.msra.mxu0 %v401_v8  ;;  %522 = vmatpush.msra.mxu2 %v513_v41  ;;  %v502_v62 = vld [vmem:[#allocation6 + $0x10] sm:$0xff]  ;;  %v501_v63 = vld [vmem:[#allocation6 + $0x8] sm:$0xff]  ;;  %v500_v0 = vld [vmem:[#allocation6] sm:$0xff] }
  0x41   : > { %473 = vmatpush.msra.mxu1 %v456_v23  ;;  %v1132_v1 = vld [vmem:[%s2333_s4] ss:$0 sm:$0xff]  ;;  %586 = vrot.lane.b32.xlu0 %v1505_v6, %s1286_s24  ;;  %v898_v4 = vld [vmem:[%s2336_s7 + $0x28] sm:$0xff] }
  0x42   : > { %423 = vmatpush.msra.mxu0 %v400_v9  ;;  %523 = vmatpush.msra.mxu2 %v512_v42  ;;  %v553_v9 = vsel %vm551_vm0, %v1048_v7, %v550_v5  ;;  %v897_v5 = vld [vmem:[%s2336_s7 + $0x20] sm:$0xff] }
  0x43   : > { %474 = vmatpush.msra.mxu1 %v455_v24  ;;  %vm554_vm1 = vcmp.ge.s32.totalorder %v553_v9, 48  ;;  %662 = vrot.lane.b32.xlu2 %v1505_v6, %s1287_s30 }
  0x44   : > { %424 = vmatpush.msra.mxu0 %v399_v10  ;;  %524 = vmatpush.msra.mxu2 %v511_v44 }
  0x45   : > { %475 = vmatpush.msra.mxu1 %v454_v26 }
  0x46   : > { %425 = vmatpush.msra.mxu0 %v398_v11  ;;  %525 = vmatpush.msra.mxu2 %v510_v47 }
  0x47   : > { %476 = vmatpush.msra.mxu1 %v453_v27 }
  0x48   : > { %426 = vmatpush.msra.mxu0 %v397_v12  ;;  %526 = vmatpush.msra.mxu2 %v509_v48  ;;  %v1049_v12 = vadd.s32 4294967248, %v553_v9 }
  0x49   : > { %477 = vmatpush.msra.mxu1 %v452_v28  ;;  %700 = vrot.lane.b32.xlu0 %v1505_v6, %s1288_s3 }
  0x4a   : > { %427 = vmatpush.msra.mxu0 %v396_v13  ;;  %527 = vmatpush.msra.mxu2 %v508_v49  ;;  %v556_v13 = vsel %vm554_vm1, %v1049_v12, %v553_v9  ;;  %v908_v49 = vld [vmem:[%s2336_s7 + $0x78] sm:$0xff]  ;;  %v893_v12 = vld [vmem:[%s2336_s7] sm:$0xff] }
  0x4b   : > { %478 = vmatpush.msra.mxu1 %v451_v31  ;;  %vm557_vm2 = vcmp.ge.s32.totalorder %v556_v13, 24  ;;  %v1050_v14 = vadd.s32 4294967272, %v556_v13  ;;  %913 = vmatpush.msra.mxu3 %v908_v49 }
  0x4c   : > { %428 = vmatpush.msra.mxu0 %v395_v16  ;;  %528 = vmatpush.msra.mxu2 %v507_v51 }
  0x4d   : > { %479 = vmatpush.msra.mxu1 %v450_v32  ;;  %v559_v15 = vsel %vm557_vm2, %v1050_v14, %v556_v13 }
  0x4e   : > { %429 = vmatpush.msra.mxu0 %v394_v18  ;;  %529 = vmatpush.msra.mxu2 %v506_v54  ;;  %vm560_vm3 = vcmp.ge.s32.totalorder %v559_v15, 12  ;;  %v1051_v16 = vadd.s32 4294967284, %v559_v15  ;;  %v905_v54 = vld [vmem:[%s2336_s7 + $0x60] sm:$0xff] }
  0x4f   : > { %430 = vmatmul.f32.vlgmr.msra.gmra.mxu0 %v390_v20  ;;  %480 = vmatpush.msra.mxu1 %v449_v33  ;;  %v1133_v33 = vld [vmem:[%s2335_s6] ss:$0 sm:$0xff] }
  0x50   : > { %530 = vmatpush.msra.mxu2 %v505_v55  ;;  %v562_v20 = vsel %vm560_vm3, %v1051_v16, %v559_v15 }
  0x51   : > { %481 = vmatpush.msra.mxu1 %v448_v34  ;;  %v1515_v21 = vsel %vm563_vm4, %v562_v20, 100 }
  0x52   : > { %531 = vmatpush.msra.mxu2 %v504_v60  ;;  %vm565_vm5 = vcmp.ge.s32.totalorder %v1515_v21, 5  ;;  %vm567_vm6 = vcmp.ge.s32.totalorder %v1515_v21, 8  ;;  %vm570_vm7 = vcmp.ge.s32.totalorder %v1515_v21, 12  ;;  %v902_v60 = vld [vmem:[%s2336_s7 + $0x48] sm:$0xff] }
  0x53   : > { %482 = vmatpush.msra.mxu1 %v447_v35  ;;  %v566_v23 = vsel %vm565_vm5, 1, %v1289_v22  ;;  %v568_v24 = vsel %vm567_vm6, 1, %v1289_v22 }
  0x54   : > { %532 = vmatpush.msra.mxu2 %v503_v61  ;;  %v569_v26 = vadd.s32 %v568_v24, %v566_v23  ;;  %v2374_v23 = vmov 0 }
  0x56   : > { %533 = vmatpush.msra.mxu2 %v502_v62  ;;  %v901_v62 = vld [vmem:[%s2336_s7 + $0x40] sm:$0xff] }
  0x57   : > { %433 = vmatmul.f32.gmra.mxu0 %v391_v25  ;;  %v571_v25 = vsel %vm570_vm7, 1, %v1289_v22 }
  0x58   : > { %534 = vmatpush.msra.mxu2 %v501_v63  ;;  %v572_v27 = vadd.s32 %v571_v25, %v569_v26 }
  0x5a   : > { %535 = vmatpush.msra.mxu2 %v500_v0  ;;  %v1520_v31 = vcvt.s32.f32 %v572_v27  ;;  %v2470_v27 = vmov 0 }
  0x5c   : > { %622 = vrot.lane.b32.xlu1 %v1520_v31, %s1285_s26  ;;  %584 = vrot.lane.b32.xlu0 %v1520_v31, %s1286_s24 }
  0x5f   : > { %436 = vmatmul.f32.gmra.mxu0 %v392_v29 }
  0x64   : > { %660 = vrot.lane.b32.xlu1 %v1520_v31, %s1287_s30  ;;  %738 = vrot.lane.b32.xlu0 %v1505_v6, %s1290_s15 }
  0x67   : > { %439 = vmatmul.f32.gmra.mxu0 %v393_v30 }
  0x6c   : > { %698 = vrot.lane.b32.xlu1 %v1520_v31, %s1288_s3  ;;  %776 = vrot.lane.b32.xlu0 %v1505_v6, %s1291_s14 }
  0x74   : > { %736 = vrot.lane.b32.xlu1 %v1520_v31, %s1290_s15  ;;  %814 = vrot.lane.b32.xlu0 %v1505_v6, %s1292_s16 }
  0x7c   : > { %774 = vrot.lane.b32.xlu1 %v1520_v31, %s1291_s14  ;;  %852 = vrot.lane.b32.xlu0 %v1505_v6, %s1293_s18 }
  0x84   : > { %812 = vrot.lane.b32.xlu1 %v1520_v31, %s1292_s16 }
  0x8c   : > { %850 = vrot.lane.b32.xlu1 %v1520_v31, %s1293_s18 }
  0xb1   : > { %v1587_v42 = vpop.permute.xlu1 %624 }
  0xb3   : > { %v1603_v44 = vpop.permute.xlu0 %586 }
  0xcc   : > { %v431_v37 = vpop.f32.mrf.mxu0 }
  0xcd   : > { %v432_v38 = vadd.f32 %v1131_v36, %v431_v37 }
  0xcf   : > { %1135 = vtanh.f32 %v432_v38 }
  0xd4   : > { %v434_v43 = vpop.f32.mrf.mxu0 }
  0xd5   : > { %v1136_v45 = vpop.eup %1135  ;;  %v435_v46 = vadd.f32 %v1131_v36, %v434_v43  ;;  %v1599_v43 = vpop.permute.xlu1 %622 }
  0xd6   : > { %483 = vmatmul.f32.vlgmr.msra.gmra.mxu1 %v1136_v45 }
  0xd7   : > { %1137 = vtanh.f32 %v435_v46  ;;  %v1613_v46 = vpop.permute.xlu0 %700 }
  0xd8   : > { %vm2343_vm12 = vcmp.lt.f32.partialorder %v1505_v6, %v1613_v46 }
  0xdc   : > { %v437_v50 = vpop.f32.mrf.mxu0 }
  0xdd   : > { %v1138_v52 = vpop.eup %1137  ;;  %v438_v53 = vadd.f32 %v1131_v36, %v437_v50  ;;  %v1611_v45 = vpop.permute.xlu1 %660  ;;  %v907_v50 = vld [vmem:[%s2336_s7 + $0x70] sm:$0xff] }
  0xde   : > { %486 = vmatmul.f32.gmra.mxu1 %v1138_v52  ;;  %914 = vmatpush.msra.mxu3 %v907_v50  ;;  %v906_v52 = vld [vmem:[%s2336_s7 + $0x68] sm:$0xff] }
  0xdf   : > { %1139 = vtanh.f32 %v438_v53  ;;  %v1623_v48 = vpop.permute.xlu0 %584  ;;  %v1638_v53 = vpop.permute.xlu2 %662 }
  0xe0   : > { %915 = vmatpush.msra.mxu3 %v906_v52  ;;  %vm2342_vm10 = vcmp.lt.f32.partialorder %v1505_v6, %v1638_v53 }
  0xe2   : > { %916 = vmatpush.msra.mxu3 %v905_v54 }
  0xe4   : > { %v440_v56 = vpop.f32.mrf.mxu0 }
  0xe5   : > { %v1140_v57 = vpop.eup %1139  ;;  %v441_v58 = vadd.f32 %v1131_v36, %v440_v56  ;;  %v1619_v47 = vpop.permute.xlu1 %698 }
  0xe6   : > { %489 = vmatmul.f32.gmra.mxu1 %v1140_v57  ;;  %v904_v57 = vld [vmem:[%s2336_s7 + $0x58] sm:$0xff] }
  0xe7   : > { %1141 = vtanh.f32 %v441_v58  ;;  %v1643_v55 = vpop.permute.xlu0 %738  ;;  %917 = vmatpush.msra.mxu3 %v904_v57 }
  0xe8   : > { %vm2344_vm15 = vcmp.lt.f32.partialorder %v1505_v6, %v1643_v55 }
  0xed   : > { %v1142_v59 = vpop.eup %1141  ;;  %v1631_v51 = vpop.permute.xlu1 %736 }
  0xee   : > { %492 = vmatmul.f32.gmra.mxu1 %v1142_v59  ;;  %v903_v59 = vld [vmem:[%s2336_s7 + $0x50] sm:$0xff] }
  0xef   : > { %918 = vmatpush.msra.mxu3 %v903_v59  ;;  %v1658_v61 = vpop.permute.xlu0 %776 }
  0xf1   : > { %919 = vmatpush.msra.mxu3 %v902_v60 }
  0xf3   : > { %920 = vmatpush.msra.mxu3 %v901_v62 }
  0xf5   : > { %v1647_v56 = vpop.permute.xlu1 %774 }
  0xfd   : > { %v1665_v63 = vpop.permute.xlu1 %812 }
 0x105   : > { %v1686_v9 = vpop.permute.xlu1 %850 }
 0x153   : > { %v484_v2 = vpop.f32.mrf.mxu1 }
 0x154   : > { %v485_v3 = vadd.f32 %v1132_v1, %v484_v2  ;;  %v899_v2 = vld [vmem:[%s2336_s7 + $0x30] sm:$0xff] }
 0x156   : > { %1143 = vtanh.f32 %v485_v3  ;;  %v1673_v3 = vpop.permute.xlu0 %814 }
 0x15b   : > { %v487_v8 = vpop.f32.mrf.mxu1 }
 0x15c   : > { %v1144_v10 = vpop.eup %1143  ;;  %v488_v11 = vadd.f32 %v1132_v1, %v487_v8  ;;  %v896_v8 = vld [vmem:[%s2336_s7 + $0x18] sm:$0xff] }
 0x15d   : > { %536 = vmatmul.f32.vlgmr.msra.gmra.mxu2 %v1144_v10  ;;  %v895_v10 = vld [vmem:[%s2336_s7 + $0x10] sm:$0xff] }
 0x15e   : > { %1145 = vtanh.f32 %v488_v11  ;;  %v894_v11 = vld [vmem:[%s2336_s7 + $0x8] sm:$0xff]  ;;  %v1699_v13 = vpop.permute.xlu0 %852 }
 0x163   : > { %v490_v17 = vpop.f32.mrf.mxu1 }
 0x164   : > { %v1146_v18 = vpop.eup %1145  ;;  %v491_v19 = vadd.f32 %v1132_v1, %v490_v17 }
 0x165   : > { %539 = vmatmul.f32.gmra.mxu2 %v1146_v18 }
 0x166   : > { %1147 = vtanh.f32 %v491_v19 }
 0x16b   : > { %v493_v28 = vpop.f32.mrf.mxu1 }
 0x16c   : > { %v1148_v29 = vpop.eup %1147  ;;  %v494_v30 = vadd.f32 %v1132_v1, %v493_v28  ;;  %v900_v1 = vld [vmem:[%s2336_s7 + $0x38] sm:$0xff] }
 0x16d   : > { %542 = vmatmul.f32.gmra.mxu2 %v1148_v29  ;;  %921 = vmatpush.msra.mxu3 %v900_v1  ;;  %v2408_v1 = vmov 0 }
 0x16e   : > { %1149 = vtanh.f32 %v494_v30  ;;  %v2477_v30 = vmov 0 }
 0x16f   : > { %922 = vmatpush.msra.mxu3 %v899_v2  ;;  %v2411_v2 = vmov 0 }
 0x171   : > { %923 = vmatpush.msra.mxu3 %v898_v4 }
 0x173   : > { %924 = vmatpush.msra.mxu3 %v897_v5 }
 0x174   : > { %v1150_v32 = vpop.eup %1149 }
 0x175   : > { %545 = vmatmul.f32.gmra.mxu2 %v1150_v32  ;;  %925 = vmatpush.msra.mxu3 %v896_v8  ;;  %v2420_v8 = vmov 0 }
 0x177   : > { %926 = vmatpush.msra.mxu3 %v895_v10  ;;  %v2424_v10 = vmov 0 }
 0x179   : > { %927 = vmatpush.msra.mxu3 %v894_v11  ;;  %v2427_v11 = vmov 0 }
 0x17b   : > { %928 = vmatpush.msra.mxu3 %v893_v12  ;;  %v2431_v12 = vmov 0 }
 0x1e0   : > { %v537_v34 = vpop.f32.mrf.mxu2 }
 0x1e1   : > { %v1549_v35 = vadd.f32 %v1133_v33, %v537_v34 }
 0x1e3   : > { %652 = vrot.lane.b32.xlu2 %v1549_v35, %s1287_s30  ;;  %614 = vrot.lane.b32.xlu1 %v1549_v35, %s1285_s26 }
 0x1e4   : > { %576 = vrot.lane.b32.xlu0 %v1549_v35, %s1286_s24 }
 0x1e8   : > { %v540_v36 = vpop.f32.mrf.mxu2 }
 0x1e9   : > { %v1557_v37 = vadd.f32 %v1133_v33, %v540_v36 }
 0x1eb   : > { %690 = vrot.lane.b32.xlu2 %v1549_v35, %s1288_s3  ;;  %730 = vrot.lane.b32.xlu1 %v1557_v37, %s1290_s15 }
 0x1ec   : > { %616 = vrot.lane.b32.xlu0 %v1557_v37, %s1285_s26 }
 0x1f0   : > { %v543_v38 = vpop.f32.mrf.mxu2 }
 0x1f1   : > { %v1571_v39 = vadd.f32 %v1133_v33, %v543_v38 }
 0x1f3   : > { %728 = vrot.lane.b32.xlu2 %v1549_v35, %s1290_s15  ;;  %844 = vrot.lane.b32.xlu1 %v1557_v37, %s1293_s18 }
 0x1f4   : > { %692 = vrot.lane.b32.xlu0 %v1557_v37, %s1288_s3 }
 0x1f8   : > { %v546_v40 = vpop.f32.mrf.mxu2 }
 0x1f9   : > { %v1585_v41 = vadd.f32 %v1133_v33, %v546_v40  ;;  %v2387_v33 = vmov 0  ;;  %v1294_v40 = vmov 0.0  }
 0x1fb   : > { %766 = vrot.lane.b32.xlu2 %v1549_v35, %s1291_s14  ;;  %656 = vrot.lane.b32.xlu1 %v1571_v39, %s1287_s30 }
 0x1fc   : > { %806 = vrot.lane.b32.xlu0 %v1557_v37, %s1292_s16 }
 0x203   : > { %804 = vrot.lane.b32.xlu2 %v1549_v35, %s1292_s16  ;;  %770 = vrot.lane.b32.xlu1 %v1571_v39, %s1291_s14 }
 0x204   : > { %618 = vrot.lane.b32.xlu0 %v1571_v39, %s1285_s26 }
 0x20b   : > { %842 = vrot.lane.b32.xlu2 %v1549_v35, %s1293_s18  ;;  %582 = vrot.lane.b32.xlu1 %v1585_v41, %s1286_s24 }
 0x20c   : > { %732 = vrot.lane.b32.xlu0 %v1571_v39, %s1290_s15 }
 0x213   : > { %578 = vrot.lane.b32.xlu2 %v1557_v37, %s1286_s24  ;;  %696 = vrot.lane.b32.xlu1 %v1585_v41, %s1288_s3 }
 0x214   : > { %846 = vrot.lane.b32.xlu0 %v1571_v39, %s1293_s18 }
 0x21b   : > { %654 = vrot.lane.b32.xlu2 %v1557_v37, %s1287_s30  ;;  %810 = vrot.lane.b32.xlu1 %v1585_v41, %s1292_s16 }
 0x21c   : > { %658 = vrot.lane.b32.xlu0 %v1585_v41, %s1287_s30 }
 0x223   : > { %768 = vrot.lane.b32.xlu2 %v1557_v37, %s1291_s14 }
 0x224   : > { %772 = vrot.lane.b32.xlu0 %v1585_v41, %s1291_s14 }
 0x22b   : > { %580 = vrot.lane.b32.xlu2 %v1571_v39, %s1286_s24 }
 0x233   : > { %694 = vrot.lane.b32.xlu2 %v1571_v39, %s1288_s3 }
 0x23b   : > { %808 = vrot.lane.b32.xlu2 %v1571_v39, %s1292_s16 }
 0x23d   : > { %v653_v58 = vpop.permute.xlu2 %652 }
 0x23e   : > { %vm668_vm8 = vcmp.eq.f32.partialorder %v1549_v35, %v653_v58  ;;  %vm664_vm13 = vcmp.gt.f32.partialorder %v1549_v35, %v653_v58  ;;  %v2396_v58 = vmov 0 }
 0x23f   : > { %vm673_vm14 = vmand %vm668_vm8, %vm2342_vm10  ;;  %vm2345_vm8 = vcmp.lt.f32.partialorder %v1505_v6, %v1587_v42 }
 0x240   : > { %vm1724_vm4 = vmor %vm664_vm13, %vm673_vm14  ;;  %vm2346_vm13 = vcmp.lt.f32.partialorder %v1505_v6, %v1603_v44 }
 0x243   : > { %620 = vrot.lane.b32.xlu2 %v1585_v41, %s1285_s26 }
 0x245   : > { %v691_v0 = vpop.permute.xlu2 %690 }
 0x246   : > { %vm706_vm9 = vcmp.eq.f32.partialorder %v1549_v35, %v691_v0  ;;  %vm702_vm0 = vcmp.gt.f32.partialorder %v1549_v35, %v691_v0  ;;  %v2405_v0 = vmov 0 }
 0x247   : > { %vm711_vm1 = vmand %vm706_vm9, %vm2343_vm12 }
 0x248   : > { %vm1729_vm6 = vmor %vm702_vm0, %vm711_vm1  ;;  %vm2348_vm1 = vcmp.ne.f32.partialorder %v1611_v45, %v1520_v31 }
 0x24b   : > { %734 = vrot.lane.b32.xlu2 %v1585_v41, %s1290_s15 }
 0x24d   : > { %v729_v7 = vpop.permute.xlu2 %728 }
 0x24e   : > { %vm744_vm11 = vcmp.eq.f32.partialorder %v1549_v35, %v729_v7  ;;  %vm740_vm2 = vcmp.gt.f32.partialorder %v1549_v35, %v729_v7  ;;  %v2417_v7 = vmov 0 }
 0x24f   : > { %vm749_vm3 = vmand %vm744_vm11, %vm2344_vm15 }
 0x250   : > { %vm1736_vm9 = vmor %vm740_vm2, %vm749_vm3  ;;  %vm2347_vm2 = vcmp.lt.f32.partialorder %v1505_v6, %v1658_v61 }
 0x251   : > { %v2375_v23 = vsel %vm1736_vm9, 4294967295, %v2374_v23 }
 0x253   : > { %848 = vrot.lane.b32.xlu2 %v1585_v41, %s1293_s18  ;;  %s2540_s18 = sadd.s32 4294967295, %s1279_s12  }
 0x254   : > { %s1046_s22 = sshll.u32 %s2540_s18, 2 }
 0x255   : > { %v767_v14 = vpop.permute.xlu2 %766  ;;  %v615_v15 = vpop.permute.xlu1 %614  ;;  %p385_p1 = scmp.lt.s32.totalorder %s1046_s22, 7 }
 0x256   : > { %v577_v17 = vpop.permute.xlu0 %576  ;;  %vm630_vm5 = vcmp.eq.f32.partialorder %v1549_v35, %v615_v15  ;;  %vm782_vm11 = vcmp.eq.f32.partialorder %v1549_v35, %v767_v14  ;;  %vm626_vm14 = vcmp.gt.f32.partialorder %v1549_v35, %v615_v15  ;;  %vm778_vm12 = vcmp.gt.f32.partialorder %v1549_v35, %v767_v14 }
 0x257   : > { %vm592_vm7 = vcmp.eq.f32.partialorder %v1549_v35, %v577_v17  ;;  %vm635_vm0 = vmand %vm630_vm5, %vm2345_vm8  ;;  %vm588_vm3 = vcmp.gt.f32.partialorder %v1549_v35, %v577_v17  ;;  %vm2349_vm5 = vcmp.ne.f32.partialorder %v1619_v47, %v1520_v31  ;;  %s2546_s22 = smov (!%p385_p1, %s1046_s22), 7 }
 0x258   : > { %vm597_vm10 = vmand %vm592_vm7, %vm2346_vm13  ;;  %vm2354_vm13 = vcmp.ne.f32.partialorder %v1599_v43, %v1520_v31  ;;  %s1047_s13 = sshll.u32 %s2546_s22, 3 }
 0x259   : > { %vm787_vm15 = vmand %vm782_vm11, %vm2347_vm2  ;;  %vm2351_vm11 = vcmp.ne.f32.partialorder %v1631_v51, %v1520_v31  ;;  %vm2350_vm2 = vcmp.ne.f32.partialorder %v1623_v48, %v1520_v31  ;;  %s388_s26 = scalar_lea.vmem %s2338_s9, %s1047_s13 }
 0x25a   : > { %vm639_vm9 = vmor %vm626_vm14, %vm635_vm0 }
 0x25b   : > { %vm1768_vm8 = vmor %vm2348_vm1, %vm1724_vm4  ;;  %vm2353_vm4 = vcmp.ne.f32.partialorder %v1647_v56, %v1520_v31 }
 0x25c   : > { %vm601_vm7 = vmor %vm588_vm3, %vm597_vm10  ;;  %vm2352_vm3 = vcmp.lt.f32.partialorder %v1505_v6, %v1673_v3 }
 0x25d   : > { %v805_v16 = vpop.permute.xlu2 %804  ;;  %v1712_v18 = vpop.permute.xlu1 %730  ;;  %vm791_vm14 = vmor %vm778_vm12, %vm787_vm15 }
 0x25e   : > { %v1741_v24 = vpop.permute.xlu0 %616  ;;  %vm820_vm0 = vcmp.eq.f32.partialorder %v1549_v35, %v805_v16  ;;  %vm1786_vm10 = vmor %vm2354_vm13, %vm639_vm9  ;;  %vm2384_vm9 = vnez %v2375_v23 }
 0x25f   : > { %vm1797_vm12 = vmor %vm2349_vm5, %vm1729_vm6  ;;  %vm816_vm6 = vcmp.gt.f32.partialorder %v1549_v35, %v805_v16  ;;  %v2444_v16 = vmov 0 }
 0x260   : > { %vm1804_vm15 = vmor %vm2350_vm2, %vm601_vm7 }
 0x261   : > { %vm1813_vm1 = vmor %vm2351_vm11, %vm2384_vm9  ;;  %vm2358_vm11 = vcmp.ne.f32.partialorder %v1665_v63, %v1520_v31 }
 0x262   : > { %vm825_vm5 = vmand %vm820_vm0, %vm2352_vm3  ;;  %vm2355_vm0 = vcmp.lt.f32.partialorder %v1505_v6, %v1699_v13 }
 0x263   : > { %vm1824_vm7 = vmor %vm2353_vm4, %vm791_vm14 }
 0x264   : > { %v2388_v33 = vsel %vm1824_vm7, 4294967295, %v2387_v33  ;;  %vm648_vm9 = vmand %vm1804_vm15, %vm1786_vm10 }
 0x265   : > { %v843_v22 = vpop.permute.xlu2 %842  ;;  %v1772_v26 = vpop.permute.xlu1 %844  ;;  %vm829_vm3 = vmor %vm816_vm6, %vm825_vm5  ;;  %vm2357_vm5 = vcmp.ne.f32.partialorder %v1686_v9, %v1520_v31 }
 0x266   : > { %vm858_vm2 = vcmp.eq.f32.partialorder %v1549_v35, %v843_v22  ;;  %v693_v34 = vpop.permute.xlu0 %692  ;;  %vm854_vm14 = vcmp.gt.f32.partialorder %v1549_v35, %v843_v22  ;;  %vm686_vm13 = vmand %vm648_vm9, %vm1768_vm8  ;;  %vm2356_vm9 = vcmp.lt.s32.totalorder %v1515_v21, 12 }
 0x267   : > { %vm863_vm4 = vmand %vm858_vm2, %vm2355_vm0  ;;  %vm2389_vm2 = vnez %v2388_v33 }
 0x268   : > { %vm834_vm10 = vmor %vm2358_vm11, %vm829_vm3 }
 0x269   : > { %vm867_vm15 = vmor %vm854_vm14, %vm863_vm4 }
 0x26a   : > { %vm724_vm7 = vmand %vm686_vm13, %vm1797_vm12  ;;  %vm631_vm13 = vcmp.eq.f32.partialorder %v1557_v37, %v1741_v24 }
 0x26b   : > { %vm762_vm6 = vmand %vm724_vm7, %vm1813_vm1  ;;  %vm627_vm7 = vcmp.gt.f32.partialorder %v1557_v37, %v1741_v24 }
 0x26c   : > { %vm800_vm0 = vmand %vm762_vm6, %vm2389_vm2  ;;  %vm2391_vm6 = vcmp.lt.f32.partialorder %v1505_v6, %v1603_v44 }
 0x26d   : > { %v579_v32 = vpop.permute.xlu2 %578  ;;  %v1846_v36 = vpop.permute.xlu1 %656  ;;  %vm838_vm8 = vmand %vm800_vm0, %vm834_vm10  ;;  %vm2390_vm0 = vcmp.lt.f32.partialorder %v1505_v6, %v1587_v42  ;;  %vm745_vm10 = vcmp.eq.f32.partialorder %v1557_v37, %v1712_v18 }
 0x26e   : > { %v807_v38 = vpop.permute.xlu0 %806  ;;  %vm872_vm4 = vmor %vm2357_vm5, %vm867_vm15  ;;  %vm593_vm1 = vcmp.eq.f32.partialorder %v1557_v37, %v579_v32  ;;  %vm589_vm15 = vcmp.gt.f32.partialorder %v1557_v37, %v579_v32  ;;  %v2479_v32 = vmov 0 }
 0x26f   : > { %vm876_vm3 = vmand %vm838_vm8, %vm872_vm4  ;;  %vm2392_vm4 = vcmp.lt.f32.partialorder %v1505_v6, %v1643_v55 }
 0x270   : > { %vm881_vm12 = vmand %vm876_vm3, %vm2356_vm9 }
 0x271   : > { %v1052_v49 = vsel %vm881_vm12, 1.0, %v1294_v40  ;;  %vm636_vm14 = vmand %vm631_vm13, %vm2390_vm0  ;;  %vm707_vm13 = vcmp.eq.f32.partialorder %v1557_v37, %v693_v34  ;;  %vm2395_vm0 = vcmp.ne.f32.partialorder %v1599_v43, %v1520_v31 }
 0x272   : > { %929 = vmatmul.f32.vlgmr.msra.gmra.mxu3 %v1052_v49  ;;  %vm598_vm2 = vmand %vm593_vm1, %vm2391_vm6  ;;  %vm741_vm6 = vcmp.gt.f32.partialorder %v1557_v37, %v1712_v18  ;;  %v2509_v49 = vmov 0 }
 0x273   : > { %vm640_vm8 = vmor %vm627_vm7, %vm636_vm14  ;;  %vm703_vm7 = vcmp.gt.f32.partialorder %v1557_v37, %v693_v34  ;;  %vm2398_vm14 = vcmp.lt.f32.partialorder %v1505_v6, %v1613_v46  ;;  %v2484_v34 = vmov 0 }
 0x274   : > { %vm1882_vm3 = vmand %vm745_vm10, %vm2392_vm4 }
 0x275   : > { %v655_v35 = vpop.permute.xlu2 %654  ;;  %v1871_v50 = vpop.permute.xlu1 %770  ;;  %vm602_vm12 = vmor %vm589_vm15, %vm598_vm2  ;;  %vm2399_vm15 = vcmp.ne.f32.partialorder %v1623_v48, %v1520_v31 }
 0x276   : > { %v619_v57 = vpop.permute.xlu0 %618  ;;  %vm1890_vm9 = vmor %vm2395_vm0, %vm640_vm8  ;;  %vm669_vm1 = vcmp.eq.f32.partialorder %v1557_v37, %v655_v35  ;;  %vm859_vm8 = vcmp.eq.f32.partialorder %v1557_v37, %v1772_v26  ;;  %vm665_vm4 = vcmp.gt.f32.partialorder %v1557_v37, %v655_v35  ;;  %vm2402_vm0 = vcmp.lt.f32.partialorder %v1505_v6, %v1638_v53 }
 0x277   : > { %v2397_v58 = vsel %vm1890_vm9, 4294967295, %v2396_v58  ;;  %vm712_vm10 = vmand %vm707_vm13, %vm2398_vm14  ;;  %vm670_vm14 = vcmp.eq.f32.partialorder %v1571_v39, %v1846_v36  ;;  %v2488_v35 = vmov 0 }
 0x278   : > { %vm1904_vm2 = vmor %vm2399_vm15, %vm602_vm12  ;;  %vm2413_vm15 = vcmp.lt.f32.partialorder %v1505_v6, %v1673_v3 }
 0x279   : > { %vm674_vm5 = vmand %vm669_vm1, %vm2402_vm0  ;;  %vm821_vm1 = vcmp.eq.f32.partialorder %v1557_v37, %v807_v38 }
 0x27a   : > { %vm1914_vm13 = vmor %vm703_vm7, %vm712_vm10  ;;  %vm2407_vm7 = vcmp.lt.f32.partialorder %v1505_v6, %v1699_v13 }
 0x27b   : > { %vm1922_vm12 = vmor %vm741_vm6, %vm1882_vm3  ;;  %vm2410_vm3 = vcmp.lt.f32.partialorder %v1505_v6, %v1638_v53 }
 0x27c   : > { %v2406_v0 = vsel %vm1922_vm12, 4294967295, %v2405_v0  ;;  %vm1934_vm10 = vmand %vm859_vm8, %vm2407_vm7  ;;  %vm2414_vm8 = vcmp.ne.f32.partialorder %v1611_v45, %v1520_v31 }
 0x27d   : > { %v769_v54 = vpop.permute.xlu2 %768  ;;  %v583_v62 = vpop.permute.xlu1 %582  ;;  %v2409_v1 = vsel %vm1934_vm10, 4294967295, %v2408_v1  ;;  %vm678_vm0 = vmor %vm665_vm4, %vm674_vm5  ;;  %vm817_vm4 = vcmp.gt.f32.partialorder %v1557_v37, %v807_v38  ;;  %v2502_v38 = vmov 0 }
 0x27e   : > { %vm1941_vm6 = vmand %vm670_vm14, %vm2410_vm3  ;;  %vm595_vm11 = vcmp.eq.f32.partialorder %v1585_v41, %v583_v62  ;;  %vm591_vm9 = vcmp.gt.f32.partialorder %v1585_v41, %v583_v62  ;;  %v733_v5 = vpop.permute.xlu0 %732  ;;  %vm2415_vm14 = vcmp.lt.f32.partialorder %v1505_v6, %v1603_v44 }
 0x27f   : > { %v2412_v2 = vsel %vm1941_vm6, 4294967295, %v2411_v2  ;;  %vm826_vm12 = vmand %vm821_vm1, %vm2413_vm15  ;;  %vm2416_vm15 = vcmp.ne.f32.partialorder %v1619_v47, %v1520_v31  ;;  %vm783_vm6 = vcmp.eq.f32.partialorder %v1557_v37, %v769_v54 }
 0x280   : > { %vm683_vm5 = vmor %vm2414_vm8, %vm678_vm0  ;;  %vm2419_vm0 = vcmp.ne.f32.partialorder %v1623_v48, %v1520_v31 }
 0x281   : > { %vm600_vm7 = vmand %vm595_vm11, %vm2415_vm14  ;;  %vm855_vm14 = vcmp.gt.f32.partialorder %v1557_v37, %v1772_v26 }
 0x282   : > { %vm604_vm3 = vmor %vm591_vm9, %vm600_vm7  ;;  %vm2422_vm7 = vnez %v2397_v58 }
 0x283   : > { %vm1962_vm1 = vmor %vm2416_vm15, %vm1914_vm13  ;;  %vm666_vm13 = vcmp.gt.f32.partialorder %v1571_v39, %v1846_v36 }
 0x284   : > { %v2418_v7 = vsel %vm1962_vm1, 4294967295, %v2417_v7  ;;  %vm1970_vm8 = vmor %vm2419_vm0, %vm604_vm3  ;;  %vm2429_vm0 = vnez %v2406_v0 }
 0x285   : > { %v581_v4 = vpop.permute.xlu2 %580  ;;  %v2421_v8 = vsel %vm1970_vm8, 4294967295, %v2420_v8  ;;  %vm830_vm11 = vmor %vm817_vm4, %vm826_vm12  ;;  %vm2426_vm12 = vcmp.lt.f32.partialorder %v1505_v6, %v1658_v61  ;;  %vm2430_vm8 = vcmp.ne.f32.partialorder %v1631_v51, %v1520_v31  ;;  %v697_v20 = vpop.permute.xlu1 %696 }
 0x286   : > { %vm594_vm9 = vcmp.eq.f32.partialorder %v1571_v39, %v581_v4  ;;  %vm2423_vm15 = vmand %vm1904_vm2, %vm2422_vm7  ;;  %vm590_vm3 = vcmp.gt.f32.partialorder %v1571_v39, %v581_v4  ;;  %vm632_vm2 = vcmp.eq.f32.partialorder %v1571_v39, %v619_v57 }
 0x287   : > { %vm1984_vm1 = vmand %vm2423_vm15, %vm683_vm5  ;;  %vm2433_vm5 = vcmp.lt.f32.partialorder %v1505_v6, %v1603_v44 }
 0x288   : > { %v2425_v10 = vsel %vm1984_vm1, 4294967295, %v2424_v10  ;;  %vm1992_vm4 = vmand %vm783_vm6, %vm2426_vm12  ;;  %vm2434_vm6 = vnez %v2409_v1  ;;  %vm2437_vm12 = vnez %v2412_v2 }
 0x289   : > { %v2428_v11 = vsel %vm1992_vm4, 4294967295, %v2427_v11  ;;  %vm2001_vm10 = vmor %vm2430_vm8, %vm2429_vm0  ;;  %vm779_vm8 = vcmp.gt.f32.partialorder %v1557_v37, %v769_v54  ;;  %v847_v37 = vpop.permute.xlu0 %846 }
 0x28a   : > { %v2432_v12 = vsel %vm2001_vm10, 4294967295, %v2431_v12  ;;  %vm599_vm7 = vmand %vm594_vm9, %vm2433_vm5  ;;  %vm2440_vm10 = vcmp.ne.f32.partialorder %v1665_v63, %v1520_v31  ;;  %vm2443_vm9 = vcmp.ne.f32.partialorder %v1623_v48, %v1520_v31  ;;  %v2450_v48 = vmov 0 }
 0x28b   : > { %vm2011_vm15 = vmor %vm855_vm14, %vm2434_vm6  ;;  %vm2448_vm6 = vnez %v2418_v7 }
 0x28c   : > { %vm2017_vm1 = vmor %vm666_vm13, %vm2437_vm12  ;;  %vm628_vm13 = vcmp.gt.f32.partialorder %v1571_v39, %v619_v57  ;;  %vm2449_vm12 = vnez %v2425_v10 }
 0x28d   : > { %vm603_vm0 = vmor %vm590_vm3, %vm599_vm7  ;;  %v695_v17 = vpop.permute.xlu2 %694  ;;  %vm2446_vm3 = vcmp.lt.f32.partialorder %v1505_v6, %v1587_v42  ;;  %v811_v29 = vpop.permute.xlu1 %810 }
 0x28e   : > { %vm2025_vm4 = vmor %vm2440_vm10, %vm830_vm11  ;;  %vm784_vm10 = vcmp.eq.f32.partialorder %v1571_v39, %v1871_v50  ;;  %vm2447_vm11 = vnez %v2428_v11 }
 0x28f   : > { %vm2032_vm14 = vmor %vm2443_vm9, %vm603_vm0  ;;  %vm746_vm9 = vcmp.eq.f32.partialorder %v1571_v39, %v733_v5 }
 0x290   : > { %v2445_v16 = vsel %vm2032_vm14, 4294967295, %v2444_v16  ;;  %vm637_vm5 = vmand %vm632_vm2, %vm2446_vm3  ;;  %vm2452_vm2 = vcmp.lt.f32.partialorder %v1505_v6, %v1658_v61 }
 0x291   : > { %vm792_vm7 = vmor %vm779_vm8, %vm2447_vm11  ;;  %vm2455_vm8 = vcmp.ne.f32.partialorder %v1647_v56, %v1520_v31  ;;  %v659_v24 = vpop.permute.xlu0 %658 }
 0x292   : > { %vm725_vm0 = vmand %vm2449_vm12, %vm2448_vm6  ;;  %vm2456_vm6 = vcmp.lt.f32.partialorder %v1505_v6, %v1643_v55 }
 0x293   : > { %vm2049_vm14 = vmor %vm628_vm13, %vm637_vm5  ;;  %vm2459_vm13 = vnez %v2432_v12 }
 0x294   : > { %v2451_v48 = vsel %vm2049_vm14, 4294967295, %v2450_v48  ;;  %vm2056_vm3 = vmand %vm784_vm10, %vm2452_vm2 }
 0x295   : > { %vm797_vm11 = vmor %vm2455_vm8, %vm792_vm7  ;;  %vm2460_vm7 = vcmp.ne.f32.partialorder %v1611_v45, %v1520_v31  ;;  %v809_v23 = vpop.permute.xlu2 %808 }
 0x296   : > { %vm2066_vm12 = vmand %vm746_vm9, %vm2456_vm6  ;;  %vm2463_vm9 = vcmp.ne.f32.partialorder %v1686_v9, %v1520_v31 }
 0x297   : > { %vm763_vm5 = vmand %vm725_vm0, %vm2459_vm13  ;;  %vm2465_vm13 = vnez %v2451_v48 }
 0x298   : > { %vm801_vm14 = vmand %vm763_vm5, %vm797_vm11  ;;  %vm708_vm11 = vcmp.eq.f32.partialorder %v1571_v39, %v695_v17  ;;  %vm2466_vm5 = vcmp.ne.f32.partialorder %v1599_v43, %v1520_v31 }
 0x299   : > { %vm839_vm10 = vmand %vm801_vm14, %vm2025_vm4  ;;  %vm742_vm4 = vcmp.gt.f32.partialorder %v1571_v39, %v733_v5  ;;  %vm2464_vm14 = vcmp.lt.s32.totalorder %v1515_v21, 12  ;;  %v773_v36 = vpop.permute.xlu0 %772 }
 0x29a   : > { %vm2079_vm2 = vmor %vm2460_vm7, %vm2017_vm1  ;;  %vm780_vm1 = vcmp.gt.f32.partialorder %v1571_v39, %v1871_v50  ;;  %v2514_v50 = vmov 0 }
 0x29b   : > { %vm873_vm8 = vmor %vm2463_vm9, %vm2011_vm15  ;;  %vm709_vm15 = vcmp.eq.f32.partialorder %v1585_v41, %v697_v20  ;;  %vm2469_vm9 = vcmp.lt.f32.partialorder %v1505_v6, %v1613_v46  ;;  %v2482_v46 = vmov 0 }
 0x29c   : > { %vm877_vm0 = vmand %vm839_vm10, %vm873_vm8  ;;  %vm704_vm10 = vcmp.gt.f32.partialorder %v1571_v39, %v695_v17 }
 0x29d   : > { %vm882_vm6 = vmand %vm877_vm0, %vm2464_vm14  ;;  %vm2472_vm14 = vnez %v2445_v16  ;;  %v621_v33 = vpop.permute.xlu2 %620 }
 0x29e   : > { %vm2099_vm7 = vmor %vm2466_vm5, %vm2465_vm13  ;;  %v1053_v26 = vsel %vm882_vm6, 1.0, %v1294_v40  ;;  %vm860_vm6 = vcmp.eq.f32.partialorder %v1571_v39, %v847_v37 }
 0x29f   : > { %932 = vmatmul.f32.gmra.mxu3 %v1053_v26  ;;  %vm713_vm8 = vmand %vm708_vm11, %vm2469_vm9 }
 0x2a0   : > { %vm2111_vm0 = vmor %vm742_vm4, %vm2066_vm12 }
 0x2a1   : > { %v2471_v27 = vsel %vm2111_vm0, 4294967295, %v2470_v27  ;;  %vm650_vm13 = vmand %vm2472_vm14, %vm2099_vm7  ;;  %vm2476_vm0 = vcmp.lt.f32.partialorder %v1505_v6, %v1699_v13 }
 0x2a2   : > { %vm2122_vm5 = vmor %vm780_vm1, %vm2056_vm3  ;;  %vm671_vm3 = vcmp.eq.f32.partialorder %v1585_v41, %v659_v24 }
 0x2a3   : > { %vm2475_vm11 = vmmov %vm2469_vm9  ;;  %vm705_vm9 = vcmp.gt.f32.partialorder %v1585_v41, %v697_v20 }
 0x2a4   : > { %vm714_vm12 = vmand %vm709_vm15, %vm2475_vm11  ;;  %vm823_vm15 = vcmp.eq.f32.partialorder %v1585_v41, %v811_v29  ;;  %vm2487_vm11 = vcmp.lt.f32.partialorder %v1505_v6, %v1673_v3  ;;  %v2499_v3 = vmov 0 }
 0x2a5   : > { %vm717_vm4 = vmor %vm704_vm10, %vm713_vm8  ;;  %vm2481_vm10 = vcmp.ne.f32.partialorder %v1619_v47, %v1520_v31 }
 0x2a6   : > { %vm2133_vm7 = vmand %vm860_vm6, %vm2476_vm0  ;;  %vm667_vm0 = vcmp.gt.f32.partialorder %v1585_v41, %v659_v24  ;;  %vm822_vm6 = vcmp.eq.f32.partialorder %v1571_v39, %v809_v23 }
 0x2a7   : > { %v2478_v30 = vsel %vm2133_vm7, 4294967295, %v2477_v30  ;;  %vm2140_vm1 = vmand %vm650_vm13, %vm2079_vm2  ;;  %vm2486_vm2 = vcmp.lt.f32.partialorder %v1505_v6, %v1638_v53  ;;  %vm785_vm7 = vcmp.eq.f32.partialorder %v1585_v41, %v773_v36 }
 0x2a8   : > { %v2480_v32 = vsel %vm2140_vm1, 4294967295, %v2479_v32  ;;  %vm2148_vm8 = vmor %vm2481_vm10, %vm717_vm4  ;;  %vm818_vm10 = vcmp.gt.f32.partialorder %v1571_v39, %v809_v23 }
 0x2a9   : > { %v2483_v46 = vsel %vm2148_vm8, 4294967295, %v2482_v46  ;;  %vm2153_vm14 = vmor %vm705_vm9, %vm714_vm12  ;;  %vm856_vm9 = vcmp.gt.f32.partialorder %v1571_v39, %v847_v37  ;;  %vm633_vm8 = vcmp.eq.f32.partialorder %v1585_v41, %v621_v33 }
 0x2aa   : > { %v2485_v34 = vsel %vm2153_vm14, 4294967295, %v2484_v34  ;;  %vm676_vm13 = vmand %vm671_vm3, %vm2486_vm2 }
 0x2ab   : > { %vm2164_vm4 = vmand %vm823_vm15, %vm2487_vm11 }
 0x2ac   : > { %v2489_v35 = vsel %vm2164_vm4, 4294967295, %v2488_v35  ;;  %vm680_vm12 = vmor %vm667_vm0, %vm676_vm13  ;;  %vm2492_vm4 = vcmp.ne.f32.partialorder %v1631_v51, %v1520_v31  ;;  %vm2495_vm13 = vcmp.ne.f32.partialorder %v1611_v45, %v1520_v31 }
 0x2ad   : > { %vm2490_vm2 = vmmov %vm2487_vm11  ;;  %vm2491_vm11 = vnez %v2471_v27 }
 0x2ae   : > { %vm827_vm14 = vmand %vm822_vm6, %vm2490_vm2  ;;  %vm781_vm6 = vcmp.gt.f32.partialorder %v1585_v41, %v773_v36 }
 0x2af   : > { %vm831_vm15 = vmor %vm818_vm10, %vm827_vm14  ;;  %vm2498_vm14 = vcmp.ne.f32.partialorder %v1647_v56, %v1520_v31 }
 0x2b0   : > { %vm2183_vm0 = vmor %vm2492_vm4, %vm2491_vm11  ;;  %vm2501_vm4 = vnez %v2478_v30  ;;  %vm2504_vm11 = vcmp.lt.f32.partialorder %v1505_v6, %v1658_v61  ;;  %v735_v61 = vpop.permute.xlu2 %734 }
 0x2b1   : > { %vm2190_vm3 = vmor %vm2495_vm13, %vm680_vm12  ;;  %vm819_vm12 = vcmp.gt.f32.partialorder %v1585_v41, %v811_v29 }
 0x2b2   : > { %vm2200_vm10 = vmor %vm2498_vm14, %vm2122_vm5  ;;  %vm2505_vm5 = vcmp.ne.f32.partialorder %v1665_v63, %v1520_v31 }
 0x2b3   : > { %v2500_v3 = vsel %vm2200_vm10, 4294967295, %v2499_v3  ;;  %vm2206_vm2 = vmor %vm856_vm9, %vm2501_vm4  ;;  %vm629_vm10 = vcmp.gt.f32.partialorder %v1585_v41, %v621_v33  ;;  %vm2508_vm9 = vnez %v2489_v35 }
 0x2b4   : > { %v2503_v38 = vsel %vm2206_vm2, 4294967295, %v2502_v38  ;;  %vm790_vm13 = vmand %vm785_vm7, %vm2504_vm11  ;;  %vm2511_vm7 = vcmp.lt.f32.partialorder %v1505_v6, %v1587_v42  ;;  %v2518_v42 = vmov 0 }
 0x2b5   : > { %vm836_vm14 = vmor %vm2505_vm5, %vm831_vm15  ;;  %vm2512_vm15 = vnez %v2485_v34 }
 0x2b6   : > { %vm2219_vm1 = vmor %vm781_vm6, %vm790_vm13  ;;  %vm2513_vm6 = vcmp.ne.f32.partialorder %v1619_v47, %v1520_v31 }
 0x2b7   : > { %vm2225_vm4 = vmor %vm819_vm12, %vm2508_vm9  ;;  %vm2516_vm12 = vcmp.ne.f32.partialorder %v1599_v43, %v1520_v31  ;;  %vm2517_vm9 = vnez %v2421_v8  ;;  %v2527_v43 = vmov 0 }
 0x2b8   : > { %v2510_v49 = vsel %vm2225_vm4, 4294967295, %v2509_v49  ;;  %vm638_vm11 = vmand %vm633_vm8, %vm2511_vm7  ;;  %vm2521_vm7 = vnez %v2483_v46  ;;  %v849_v47 = vpop.permute.xlu2 %848 }
 0x2b9   : > { %vm642_vm2 = vmor %vm629_vm10, %vm638_vm11  ;;  %vm2520_vm10 = vnez %v2480_v32 }
 0x2ba   : > { %vm2237_vm13 = vmor %vm2513_vm6, %vm2512_vm15  ;;  %vm2523_vm6 = vnez %v2500_v3 }
 0x2bb   : > { %v2515_v50 = vsel %vm2237_vm13, 4294967295, %v2514_v50  ;;  %vm647_vm5 = vmor %vm2516_vm12, %vm642_vm2  ;;  %vm2526_vm13 = vcmp.ne.f32.partialorder %v1647_v56, %v1520_v31 }
 0x2bc   : > { %vm651_vm4 = vmand %vm2517_vm9, %vm647_vm5  ;;  %vm2524_vm5 = vnez %v2503_v38 }
 0x2bd   : > { %vm2248_vm8 = vmand %vm651_vm4, %vm2190_vm3  ;;  %vm2525_vm3 = vcmp.ne.f32.partialorder %v1686_v9, %v1520_v31 }
 0x2be   : > { %v2519_v42 = vsel %vm2248_vm8, 4294967295, %v2518_v42  ;;  %vm2522_vm11 = vmand %vm2520_vm10, %vm2521_vm7  ;;  %vm747_vm8 = vcmp.eq.f32.partialorder %v1585_v41, %v735_v61  ;;  %vm743_vm7 = vcmp.gt.f32.partialorder %v1585_v41, %v735_v61 }
 0x2bf   : > { %vm764_vm15 = vmand %vm2522_vm11, %vm2183_vm0  ;;  %vm2529_vm0 = vcmp.lt.s32.totalorder %v1515_v21, 12  ;;  %vm2530_vm11 = vnez %v2510_v49 }
 0x2c0   : > { %vm802_vm2 = vmand %vm764_vm15, %vm2523_vm6  ;;  %vm2531_vm15 = vcmp.ne.f32.partialorder %v1665_v63, %v1520_v31 }
 0x2c1   : > { %vm840_vm12 = vmand %vm802_vm2, %vm836_vm14  ;;  %vm2532_vm2 = vnez %v2515_v50 }
 0x2c2   : > { %vm874_vm4 = vmor %vm2525_vm3, %vm2524_vm5 }
 0x2c3   : > { %vm878_vm9 = vmand %vm840_vm12, %vm874_vm4  ;;  %vm2534_vm12 = vcmp.lt.f32.partialorder %v1505_v6, %v1643_v55  ;;  %vm861_vm4 = vcmp.eq.f32.partialorder %v1585_v41, %v849_v47 }
 0x2c4   : > { %vm2272_vm10 = vmor %vm2526_vm13, %vm2219_vm1  ;;  %vm2533_vm1 = vnez %v2519_v42 }
 0x2c5   : > { %v2528_v43 = vsel %vm2272_vm10, 4294967295, %v2527_v43  ;;  %vm883_vm14 = vmand %vm878_vm9, %vm2529_vm0  ;;  %vm2535_vm9 = vcmp.ne.f32.partialorder %v1631_v51, %v1520_v31  ;;  %vm2537_vm10 = vcmp.ne.f32.partialorder %v1686_v9, %v1520_v31 }
 0x2c6   : > { %vm837_vm6 = vmor %vm2531_vm15, %vm2530_vm11  ;;  %v1054_v52 = vsel %vm883_vm14, 1.0, %v1294_v40  ;;  %vm857_vm14 = vcmp.gt.f32.partialorder %v1585_v41, %v849_v47  ;;  %vm2536_vm15 = vcmp.lt.f32.partialorder %v1505_v6, %v1699_v13  ;;  %v1134_v6 = vld [vmem:[%s2337_s8] ss:$0 sm:$0xff] }
 0x2c7   : > { %vm727_vm13 = vmand %vm2533_vm1, %vm2532_vm2  ;;  %935 = vmatmul.f32.gmra.mxu3 %v1054_v52 }
 0x2c8   : > { %vm752_vm5 = vmand %vm747_vm8, %vm2534_vm12 }
 0x2c9   : > { %vm756_vm3 = vmor %vm743_vm7, %vm752_vm5  ;;  %vm2538_vm7 = vnez %v2528_v43 }
 0x2ca   : > { %vm761_vm0 = vmor %vm2535_vm9, %vm756_vm3  ;;  %vm2539_vm9 = vcmp.lt.s32.totalorder %v1515_v21, 12 }
 0x2cb   : > { %vm765_vm11 = vmand %vm727_vm13, %vm761_vm0 }
 0x2cc   : > { %vm866_vm2 = vmand %vm861_vm4, %vm2536_vm15 }
 0x2cd   : > { %vm870_vm1 = vmor %vm857_vm14, %vm866_vm2 }
 0x2ce   : > { %vm875_vm8 = vmor %vm2537_vm10, %vm870_vm1  ;;  %vm942_vm10 = vcmask 97280  }
 0x2cf   : > { %vm803_vm12 = vmand %vm765_vm11, %vm2538_vm7 }
 0x2d0   : > { %vm841_vm5 = vmand %vm803_vm12, %vm837_vm6 }
 0x2d1   : > { %vm879_vm3 = vmand %vm841_vm5, %vm875_vm8 }
 0x2d2   : > { %vm884_vm0 = vmand %vm879_vm3, %vm2539_vm9 }
 0x2d3   : > { %v1055_v41 = vsel %vm884_vm0, 1.0, %v1294_v40 }
 0x2d4   : > { %938 = vmatmul.f32.gmra.mxu3 %v1055_v41 }
 0x2f5   : > { %v930_v31 = vpop.f32.mrf.mxu3 }
 0x2f6   : > { %v931_v21 = vadd.f32 %v1134_v6, %v930_v31 }
 0x2f8   : > { %943 = vst.msk [vmem:[%s388_s26] sm:$0xff] %vm942_vm10, %v931_v21 }
 0x322   : > { %v933_v51 = vpop.f32.mrf.mxu3 }
 0x323   : > { %v934_v55 = vadd.f32 %v1134_v6, %v933_v51 }
 0x325   : > { %944 = vst.msk [vmem:[%s388_s26 + $0x8] sm:$0xff] %vm942_vm10, %v934_v55 }
 0x34a   : > { %v936_v56 = vpop.f32.mrf.mxu3 }
 0x34b   : > { %v937_v63 = vadd.f32 %v1134_v6, %v936_v56 }
 0x34d   : > { %945 = vst.msk [vmem:[%s388_s26 + $0x10] sm:$0xff] %vm942_vm10, %v937_v63 }
 0x357   : > { %v939_v9 = vpop.f32.mrf.mxu3 }
 0x358   : > { %v940_v13 = vadd.f32 %v1134_v6, %v939_v9 }
 0x35a   : > { %946 = vst.msk [vmem:[%s388_s26 + $0x18] sm:$0xff] %vm942_vm10, %v940_v13 }
 0x35b PF: > { %p20_p4 = scmp.ge.s32.totalorder %s1400_s29, 4   ;;  %s2541_s30 = smov %s1271_s10 }
 0x35c   : > { %s2542_s10 = smov %s1275_s11  ;;  %s2543_s11 = smov %s1410_s20 }
 0x35d   : > { %s2544_s12 = smov %s1400_s29  ;;  %22 = sbr.rel (!%p20_p4) target bundleno = 6 (0x6), region = 104 }
 0x362   :  { %969 = vsyncpa [#allocation3], 1 }
 0x363   :  { %971 = vsyncpa [#allocation3 + $0x1], 1 }
 0x364   :  { %972 = vsyncpa [#allocation5], 1 }

</bundles_post_ra>
